<compile_context>
chip_gen: v5e
topology: v5e:2x2
jax: 0.10.0
libtpu: 0.0.40
codegen_flags: <defaults>
</compile_context>

<pallas_src>
import math
import inspect
import functools

import jax
import jax.numpy as jnp
from jax import lax
from jax.experimental import pallas as pl
from jax.experimental.pallas import tpu as pltpu


# ----------------------------------------------------------------------------
# Kernel. grid = (B, T // TQ);  batch axis "parallel", query-tile axis "arbitrary".
# ----------------------------------------------------------------------------
def _block_kernel(
    # inputs
    x_ref,                      # (T, C)   f32   full sequence for this batch element
    ln1_g_ref, ln1_b_ref,       # (1, C)   f32
    wqkv_ref, bqkv_ref,         # (C, 3C)  bf16, (1, 3C) f32   fused QKV projection
    wp_ref, bp_ref,             # (C, C)   bf16, (1, C)  f32   output projection (orig layout)
    ln2_g_ref, ln2_b_ref,       # (1, C)   f32
    w1_ref, b1_ref,             # (C, 4C)  bf16, (1, 4C) f32
    w2_ref, b2_ref,             # (4C, C)  bf16, (1, C)  f32
    # outputs
    y_ref,                      # (TQ, C)        query-row tile of the block output
    att_ref,                    # (H, TQ, T)     pre-softmax scaled scores (att_to_check)
    # scratch (persists across the query-tile grid axis)
    q_s,                        # (H, T, D) bf16 pre-scaled queries, head-major
    k_s, v_s,                   # (H, T, D) bf16 keys / values, head-major
    ctx_s,                      # (TQ, C)   bf16 head-concatenated attention context
    *,
    n_head: int,
    qkv_chunk: int,
):
    f32, bf16 = jnp.float32, jnp.bfloat16
    eps = 1e-5
    T, C = x_ref.shape
    H = n_head
    D = C // H
    TQ = y_ref.shape[0]
    scale = 1.0 / math.sqrt(D)
    inv_sqrt2 = 1.0 / math.sqrt(2.0)
    t = pl.program_id(1)

    # ---- once per batch element: LN1 + fused bf16 QKV matmul, chunked over rows,
    #      repacked head-major into scratch (bounds the live (chunk,3C) f32 temp) ----
    @pl.when(t == 0)
    def _():
        n_chunks = T // qkv_chunk

        def ln_qkv_chunk(row):
            xc = x_ref[pl.ds(row, qkv_chunk), :].astype(f32)           # (R, C)
            mu = jnp.mean(xc, axis=-1, keepdims=True)
            var = jnp.mean((xc - mu) ** 2, axis=-1, keepdims=True)
            xn = (xc - mu) * lax.rsqrt(var + eps) * ln1_g_ref[...] + ln1_b_ref[...]
            qkv = jnp.dot(xn.astype(bf16), wqkv_ref[...],
                          preferred_element_type=f32) + bqkv_ref[...]  # (R, 3C) f32
            # Head-major repack; 1/sqrt(D) folded into q so the score matmul directly
            # produces the scaled pre-softmax scores (== att_to_check).
            for h in range(H):
                q_s[h, pl.ds(row, qkv_chunk), :] = (
                    qkv[:, h * D:(h + 1) * D] * scale).astype(bf16)
                k_s[h, pl.ds(row, qkv_chunk), :] = (
                    qkv[:, C + h * D:C + (h + 1) * D]).astype(bf16)
                v_s[h, pl.ds(row, qkv_chunk), :] = (
                    qkv[:, 2 * C + h * D:2 * C + (h + 1) * D]).astype(bf16)

        if n_chunks == 1:
            ln_qkv_chunk(0)
        else:
            @pl.loop(0, n_chunks)
            def _(ci):
                ln_qkv_chunk(pl.multiple_of(ci * qkv_chunk, qkv_chunk))

    # ---- per query-row tile --------------------------------------------------
    row0 = pl.multiple_of(t * TQ, TQ)
    x_t = x_ref[pl.ds(row0, TQ), :].astype(f32)          # (TQ, C)  residual base

    q_t = q_s[:, pl.ds(row0, TQ), :]                     # (H, TQ, D) bf16, pre-scaled
    k_all = k_s[...]                                     # (H, T, D)  bf16
    v_all = v_s[...]                                     # (H, T, D)  bf16

    # scaled pre-softmax scores: bf16 operands, f32 accumulation on the MXU
    att = jnp.einsum("hqd,hkd->hqk", q_t, k_all,
                     preferred_element_type=f32)         # (H, TQ, T) f32
    att_ref[...] = att.astype(att_ref.dtype)

    # numerically-stable softmax in f32; approx reciprocal uses the EUP slot
    m = jnp.max(att, axis=-1, keepdims=True)
    p = jnp.exp(att - m)
    p = p * pl.reciprocal(jnp.sum(p, axis=-1, keepdims=True), approx=True)

    ctx = jnp.einsum("hqk,hkd->hqd", p.astype(bf16), v_all,
                     preferred_element_type=f32)         # (H, TQ, D) f32

    # head-concat into (TQ, C) via static lane-slice stores, then ONE K=C matmul
    # against the ORIGINAL wp layout (no per-head small-K matmuls, no f32 temp).
    for h in range(H):
        ctx_s[:, h * D:(h + 1) * D] = ctx[h].astype(bf16)
    y_att = jnp.dot(ctx_s[...], wp_ref[...],
                    preferred_element_type=f32) + bp_ref[...]          # (TQ, C)

    # residual 1
    x1 = x_t + y_att

    # ---- LayerNorm 2 (f32) ---------------------------------------------------
    mu2 = jnp.mean(x1, axis=-1, keepdims=True)
    var2 = jnp.mean((x1 - mu2) ** 2, axis=-1, keepdims=True)
    x2n = (x1 - mu2) * lax.rsqrt(var2 + eps) * ln2_g_ref[...] + ln2_b_ref[...]

    # ---- MLP: Linear(C,4C) -> exact GELU -> Linear(4C,C) ---------------------
    hdn = jnp.dot(x2n.astype(bf16), w1_ref[...],
                  preferred_element_type=f32) + b1_ref[...]
    hdn = 0.5 * hdn * (1.0 + lax.erf(hdn * inv_sqrt2))   # exact GELU (PyTorch default)
    mlp = jnp.dot(hdn.astype(bf16), w2_ref[...],
                  preferred_element_type=f32) + b2_ref[...]

    # residual 2
    y_ref[...] = (x1 + mlp).astype(y_ref.dtype)


# ----------------------------------------------------------------------------
# Wrapper helpers
# ----------------------------------------------------------------------------
def _vmem_limit_bytes():
    """Per-generation scoped-VMEM request: ~80% of physical, capped at 100 MiB."""
    cap = None
    try:
        info = pltpu.get_tpu_info()
        for name in ("vmem_capacity_bytes", "vmem_bytes", "vmem_size_bytes"):
            v = getattr(info, name, None)
            if v:
                cap = int(v)
                break
    except Exception:
        cap = None
    if cap is None:
        return 64 * 1024 * 1024                      # conservative, known-good default
    return max(32 * 1024 * 1024, min(cap * 4 // 5, 100 * 1024 * 1024))


def _pick_t_block(T, H, C, att_itemsize, vmem_limit):
    """Largest query tile whose per-step activations fit a fraction of the VMEM budget."""
    budget = int(vmem_limit * 0.35)
    smallest = None
    for cand in (256, 128, 64, 32, 16):
        if T % cand:
            continue
        smallest = cand
        per_tile = (H * cand * T * 4                      # f32 score tile
                    + 2 * H * cand * T * att_itemsize     # double-buffered att out block
                    + cand * 4 * C * 4                    # MLP hidden (f32)
                    + 4 * cand * C * 4)                   # x tile / y out / misc
        if per_tile <= budget:
            return cand
    return smallest if smallest is not None else T


def _pick_qkv_chunk(T):
    for cand in (256, 128, 64, 32, 16):
        if T % cand == 0:
            return cand
    return T


def _supports_pipeline_mode():
    try:
        return (hasattr(pl, "Buffered")
                and "pipeline_mode" in inspect.signature(pl.BlockSpec).parameters)
    except (TypeError, ValueError):
        return False


# Narrow, explicit fallback set for the Buffered(1) weight-spec attempt.  Genuine
# problems (shape bugs, VMEM OOM, ...) reproduce in the unbuffered build and are
# re-raised there, so nothing is silently masked — only the buffering mode changes.
_PIPELINE_MODE_FALLBACK_ERRORS = (TypeError, ValueError, NotImplementedError,
                                  AssertionError, RuntimeError)
if hasattr(pltpu, "LoweringException"):
    _PIPELINE_MODE_FALLBACK_ERRORS = _PIPELINE_MODE_FALLBACK_ERRORS + (pltpu.LoweringException,)


# ----------------------------------------------------------------------------
# Wrapper
# ----------------------------------------------------------------------------
def block_forward(x, params, n_head, *, t_block=None, qkv_chunk=None,
                  att_dtype=jnp.float32):
    """Forward pass of Block.  att_dtype=jnp.bfloat16 halves the dominant O(H*T^2)
    att_to_check HBM writeback; default float32 matches the PyTorch module."""
    B, T, C = x.shape
    H = n_head
    assert C % H == 0
    D = C // H
    F4 = 4 * C
    f32, bf16 = jnp.float32, jnp.bfloat16

    vmem_limit = _vmem_limit_bytes()
    att_itemsize = jnp.dtype(att_dtype).itemsize

    if t_block is None:
        t_block = _pick_t_block(T, H, C, att_itemsize, vmem_limit)
    # bf16 Q/K/V scratch is sublane-packed -> dynamic row offsets must be multiples of 16
    assert T % t_block == 0 and (t_block % 16 == 0 or t_block == T), \
        "t_block must divide T and be a multiple of 16 (or equal T)"
    nt = T // t_block

    if qkv_chunk is None:
        qkv_chunk = _pick_qkv_chunk(T)
    assert T % qkv_chunk == 0 and (qkv_chunk % 16 == 0 or qkv_chunk == T), \
        "qkv_chunk must divide T and be a multiple of 16 (or equal T)"

    # Weight preprocessing (plain XLA, outside the kernel): fused QKV weight and
    # bf16 matmul operands.  wp stays in its ORIGINAL (C, C) layout (single K=C matmul).
    wqkv = jnp.concatenate([params["wq"], params["wk"], params["wv"]], axis=1).astype(bf16)
    bqkv = jnp.concatenate([params["bq"], params["bk"], params["bv"]], axis=1).astype(f32)
    wp = params["wp"].astype(bf16)
    w1 = params["w1"].astype(bf16)
    w2 = params["w2"].astype(bf16)

    args = (
        x,
        params["ln1_g"].astype(f32), params["ln1_b"].astype(f32),
        wqkv, bqkv,
        wp, params["bp"].astype(f32),
        params["ln2_g"].astype(f32), params["ln2_b"].astype(f32),
        w1, params["b1"].astype(f32),
        w2, params["b2"].astype(f32),
    )

    has_pipeline_mode = _supports_pipeline_mode()

    def build(buffer_weights_once):
        def wspec(shape):
            zeros = (0,) * len(shape)
            idx = lambda b, t: zeros
            if buffer_weights_once:
                # constant index_map -> fetched once; a single buffer halves weight VMEM
                return pl.BlockSpec(shape, idx, pipeline_mode=pl.Buffered(1))
            return pl.BlockSpec(shape, idx)

        in_specs = [
            pl.BlockSpec((None, T, C), lambda b, t: (b, 0, 0)),     # x (full seq per batch elem)
            wspec((1, C)), wspec((1, C)),                           # ln1 gamma, beta
            wspec((C, 3 * C)), wspec((1, 3 * C)),                   # Wqkv, bqkv
            wspec((C, C)), wspec((1, C)),                           # Wproj (orig layout), bproj
            wspec((1, C)), wspec((1, C)),                           # ln2 gamma, beta
            wspec((C, F4)), wspec((1, F4)),                         # W1, b1
            wspec((F4, C)), wspec((1, C)),                          # W2, b2
        ]
        out_specs = (
            pl.BlockSpec((None, t_block, C), lambda b, t: (b, t, 0)),        # y tile
            pl.BlockSpec((None, H, t_block, T), lambda b, t: (b, 0, t, 0)),  # att tile
        )
        out_shape = (
            jax.ShapeDtypeStruct((B, T, C), x.dtype),
            jax.ShapeDtypeStruct((B, H, T, T), att_dtype),
        )
        scratch = [
            pltpu.VMEM((H, T, D), jnp.bfloat16),    # pre-scaled Q (bf16)
            pltpu.VMEM((H, T, D), jnp.bfloat16),    # K
            pltpu.VMEM((H, T, D), jnp.bfloat16),    # V
            pltpu.VMEM((t_block, C), jnp.bfloat16), # head-concatenated context
        ]
        return pl.pallas_call(
            functools.partial(_block_kernel, n_head=H, qkv_chunk=qkv_chunk),
            grid=(B, nt),
            in_specs=in_specs,
            out_specs=out_specs,
            out_shape=out_shape,
            scratch_shapes=scratch,
            compiler_params=pltpu.CompilerParams(
                dimension_semantics=("parallel", "arbitrary"),
                vmem_limit_bytes=vmem_limit,
            ),
        )

    if has_pipeline_mode:
        try:
            return build(True)(*args)
        except _PIPELINE_MODE_FALLBACK_ERRORS:
            pass  # Buffered(1) rejected by this build's pipeline; use default buffering.
    return build(False)(*args)


# ----------------------------------------------------------------------------
# Deterministic parameters + pure-JAX f32 reference for validation
# ----------------------------------------------------------------------------
def make_params(key, C):
    ks = jax.random.split(key, 13)
    s = 0.02
    return {
        "ln1_g": 1.0 + 0.1 * jax.random.normal(ks[0], (1, C), jnp.float32),
        "ln1_b": 0.1 * jax.random.normal(ks[1], (1, C), jnp.float32),
        "wq": jax.random.normal(ks[2], (C, C), jnp.float32) * s,
        "bq": jax.random.normal(ks[3], (1, C), jnp.float32) * s,
        "wk": jax.random.normal(ks[4], (C, C), jnp.float32) * s,
        "bk": jax.random.normal(ks[5], (1, C), jnp.float32) * s,
        "wv": jax.random.normal(ks[6], (C, C), jnp.float32) * s,
        "bv": jax.random.normal(ks[7], (1, C), jnp.float32) * s,
        "wp": jax.random.normal(ks[8], (C, C), jnp.float32) * s,
        "bp": jax.random.normal(ks[9], (1, C), jnp.float32) * s,
        "ln2_g": 1.0 + 0.1 * jax.random.normal(ks[10], (1, C), jnp.float32),
        "ln2_b": 0.1 * jax.random.normal(ks[11], (1, C), jnp.float32),
        "w1": jax.random.normal(ks[12], (C, 4 * C), jnp.float32) * s,
        "b1": jnp.zeros((1, 4 * C), jnp.float32),
        "w2": jax.random.normal(jax.random.fold_in(key, 99), (4 * C, C), jnp.float32) * s,
        "b2": jnp.zeros((1, C), jnp.float32),
    }


def ref_block(x, p, n_head):
    eps = 1e-5
    B, T, C = x.shape
    D = C // n_head

    def ln(z, g, b):
        mu = jnp.mean(z, -1, keepdims=True)
        var = jnp.mean((z - mu) ** 2, -1, keepdims=True)
        return (z - mu) * lax.rsqrt(var + eps) * g + b

    xn = ln(x, p["ln1_g"], p["ln1_b"])
    q = (xn @ p["wq"] + p["bq"]).reshape(B, T, n_head, D).transpose(0, 2, 1, 3)
    k = (xn @ p["wk"] + p["bk"]).reshape(B, T, n_head, D).transpose(0, 2, 1, 3)
    v = (xn @ p["wv"] + p["bv"]).reshape(B, T, n_head, D).transpose(0, 2, 1, 3)
    att = jnp.einsum("bhtd,bhsd->bhts", q, k) / math.sqrt(D)
    att_to_check = att
    att_sm = jax.nn.softmax(att, axis=-1)
    y = jnp.einsum("bhts,bhsd->bhtd", att_sm, v).transpose(0, 2, 1, 3).reshape(B, T, C)
    y = y @ p["wp"] + p["bp"]
    x = x + y
    x2n = ln(x, p["ln2_g"], p["ln2_b"])
    h = x2n @ p["w1"] + p["b1"]
    h = jax.nn.gelu(h, approximate=False)
    x = x + (h @ p["w2"] + p["b2"])
    return x, att_to_check


# ----------------------------------------------------------------------------
if __name__ == "__main__":
    B, T, C, H = 2, 32, 32, 4   # batch, seq, n_embd, n_head

    key = jax.random.PRNGKey(0)
    kx, kp = jax.random.split(key)
    x = jax.random.normal(kx, (B, T, C), jnp.float32)
    params = make_params(kp, C)

    # t_block=16 -> two query tiles per batch element; qkv_chunk=16 -> two LN1+QKV row
    # chunks; exercises both the tiled attention path and the chunked t==0 phase.
    y, att = block_forward(x, params, H, t_block=16, qkv_chunk=16)
    y = jax.block_until_ready(y)
    att = jax.block_until_ready(att)

    y_ref, att_ref = ref_block(x, params, H)
    assert y.shape == (B, T, C) and att.shape == (B, H, T, T)
    # bf16 matmul operands (f32 accumulation) loosen the tolerance vs. the pure-f32 reference
    assert jnp.allclose(y, y_ref, atol=2e-2, rtol=2e-2), float(jnp.max(jnp.abs(y - y_ref)))
    assert jnp.allclose(att.astype(jnp.float32), att_ref, atol=2e-2, rtol=2e-2), \
        float(jnp.max(jnp.abs(att.astype(jnp.float32) - att_ref)))

    print("KERNEL_OK")
</pallas_src>

<mosaic_0001>
module attributes {stable_mosaic.version = 11 : i64} {
  func.func @_block_kernel(%arg0: i32, %arg1: i32, %arg2: memref<1x32x32xf32, #tpu.memory_space<vmem>>, %arg3: memref<1x32xf32, #tpu.memory_space<vmem>>, %arg4: memref<1x32xf32, #tpu.memory_space<vmem>>, %arg5: memref<32x96xbf16, #tpu.memory_space<vmem>>, %arg6: memref<1x96xf32, #tpu.memory_space<vmem>>, %arg7: memref<32x32xbf16, #tpu.memory_space<vmem>>, %arg8: memref<1x32xf32, #tpu.memory_space<vmem>>, %arg9: memref<1x32xf32, #tpu.memory_space<vmem>>, %arg10: memref<1x32xf32, #tpu.memory_space<vmem>>, %arg11: memref<32x128xbf16, #tpu.memory_space<vmem>>, %arg12: memref<1x128xf32, #tpu.memory_space<vmem>>, %arg13: memref<128x32xbf16, #tpu.memory_space<vmem>>, %arg14: memref<1x32xf32, #tpu.memory_space<vmem>>, %arg15: memref<1x16x32xf32, #tpu.memory_space<vmem>>, %arg16: memref<1x4x16x32xf32, #tpu.memory_space<vmem>>, %arg17: memref<4x32x8xbf16, #tpu.memory_space<vmem>>, %arg18: memref<4x32x8xbf16, #tpu.memory_space<vmem>>, %arg19: memref<4x32x8xbf16, #tpu.memory_space<vmem>>, %arg20: memref<16x32xbf16, #tpu.memory_space<vmem>>) attributes {dimension_semantics = [#tpu.dimension_semantics<parallel>, #tpu.dimension_semantics<arbitrary>], iteration_bounds = array<i64: 2, 2>, scalar_prefetch = 0 : i64, scratch_operands = 4 : i64, tpu.core_type = #tpu.core_type<tc>, window_params = [{transform_indices = @transform_0, window_bounds = array<i64: 1, 32, 32>}, {pipeline_mode = #tpu.pipeline_mode<synchronous>, transform_indices = @transform_1, window_bounds = array<i64: 1, 32>}, {pipeline_mode = #tpu.pipeline_mode<synchronous>, transform_indices = @transform_2, window_bounds = array<i64: 1, 32>}, {pipeline_mode = #tpu.pipeline_mode<synchronous>, transform_indices = @transform_3, window_bounds = array<i64: 32, 96>}, {pipeline_mode = #tpu.pipeline_mode<synchronous>, transform_indices = @transform_4, window_bounds = array<i64: 1, 96>}, {pipeline_mode = #tpu.pipeline_mode<synchronous>, transform_indices = @transform_5, window_bounds = array<i64: 32, 32>}, {pipeline_mode = #tpu.pipeline_mode<synchronous>, transform_indices = @transform_6, window_bounds = array<i64: 1, 32>}, {pipeline_mode = #tpu.pipeline_mode<synchronous>, transform_indices = @transform_7, window_bounds = array<i64: 1, 32>}, {pipeline_mode = #tpu.pipeline_mode<synchronous>, transform_indices = @transform_8, window_bounds = array<i64: 1, 32>}, {pipeline_mode = #tpu.pipeline_mode<synchronous>, transform_indices = @transform_9, window_bounds = array<i64: 32, 128>}, {pipeline_mode = #tpu.pipeline_mode<synchronous>, transform_indices = @transform_10, window_bounds = array<i64: 1, 128>}, {pipeline_mode = #tpu.pipeline_mode<synchronous>, transform_indices = @transform_11, window_bounds = array<i64: 128, 32>}, {pipeline_mode = #tpu.pipeline_mode<synchronous>, transform_indices = @transform_12, window_bounds = array<i64: 1, 32>}, {transform_indices = @transform_13, window_bounds = array<i64: 1, 16, 32>}, {transform_indices = @transform_14, window_bounds = array<i64: 1, 4, 16, 32>}]} {
    %c0_i32 = arith.constant 0 : i32
    %0 = arith.cmpi eq, %arg1, %c0_i32 : i32
    %1 = arith.extui %0 : i1 to i32
    %c0_i32_0 = arith.constant 0 : i32
    %2 = arith.cmpi ne, %1, %c0_i32_0 : i32
    scf.if %2 {
      %c0_i32_54 = arith.constant 0 : i32
      %c2_i32 = arith.constant 2 : i32
      %99 = arith.addi %c0_i32_54, %c2_i32 : i32
      %c1_i32 = arith.constant 1 : i32
      scf.for %arg21 = %c0_i32_54 to %99 step %c1_i32  : i32 {
        %c1_i32_56 = arith.constant 1 : i32
        %100 = arith.muli %arg21, %c1_i32_56 : i32
        %c0_i32_57 = arith.constant 0 : i32
        %101 = arith.addi %c0_i32_57, %100 : i32
        %c16_i32_58 = arith.constant 16 : i32
        %102 = arith.muli %101, %c16_i32_58 : i32
        %103 = tpu.assume_multiple %102, 16 : i32
        %c0_59 = arith.constant 0 : index
        %104 = arith.index_cast %103 : i32 to index
        %c0_60 = arith.constant 0 : index
        %105 = vector.load %arg2[%c0_59, %104, %c0_60] : memref<1x32x32xf32, #tpu.memory_space<vmem>>, vector<1x16x32xf32>
        %106 = vector.shape_cast %105 : vector<1x16x32xf32> to vector<16x32xf32>
        %cst_61 = arith.constant dense<0.000000e+00> : vector<16xf32>
        %107 = vector.multi_reduction <add>, %106, %cst_61 [1] : vector<16x32xf32> to vector<16xf32>
        %108 = vector.shape_cast %107 : vector<16xf32> to vector<16x1xf32>
        %cst_62 = arith.constant 3.200000e+01 : f32
        %109 = vector.broadcast %cst_62 : f32 to vector<16x1xf32>
        %110 = arith.divf %108, %109 : vector<16x1xf32>
        %111 = vector.broadcast %110 : vector<16x1xf32> to vector<16x32xf32>
        %112 = arith.subf %106, %111 : vector<16x32xf32>
        %113 = arith.mulf %112, %112 : vector<16x32xf32>
        %cst_63 = arith.constant dense<0.000000e+00> : vector<16xf32>
        %114 = vector.multi_reduction <add>, %113, %cst_63 [1] : vector<16x32xf32> to vector<16xf32>
        %115 = vector.shape_cast %114 : vector<16xf32> to vector<16x1xf32>
        %cst_64 = arith.constant 3.200000e+01 : f32
        %116 = vector.broadcast %cst_64 : f32 to vector<16x1xf32>
        %117 = arith.divf %115, %116 : vector<16x1xf32>
        %118 = vector.broadcast %110 : vector<16x1xf32> to vector<16x32xf32>
        %119 = arith.subf %106, %118 : vector<16x32xf32>
        %cst_65 = arith.constant 9.99999974E-6 : f32
        %120 = vector.broadcast %cst_65 : f32 to vector<16x1xf32>
        %121 = arith.addf %117, %120 : vector<16x1xf32>
        %122 = math.rsqrt %121 : vector<16x1xf32>
        %123 = vector.broadcast %122 : vector<16x1xf32> to vector<16x32xf32>
        %124 = arith.mulf %119, %123 : vector<16x32xf32>
        %c0_66 = arith.constant 0 : index
        %c0_67 = arith.constant 0 : index
        %125 = vector.load %arg3[%c0_66, %c0_67] : memref<1x32xf32, #tpu.memory_space<vmem>>, vector<1x32xf32>
        %126 = vector.broadcast %125 : vector<1x32xf32> to vector<16x32xf32>
        %127 = arith.mulf %124, %126 : vector<16x32xf32>
        %c0_68 = arith.constant 0 : index
        %c0_69 = arith.constant 0 : index
        %128 = vector.load %arg4[%c0_68, %c0_69] : memref<1x32xf32, #tpu.memory_space<vmem>>, vector<1x32xf32>
        %129 = vector.broadcast %128 : vector<1x32xf32> to vector<16x32xf32>
        %130 = arith.addf %127, %129 : vector<16x32xf32>
        %131 = arith.truncf %130 : vector<16x32xf32> to vector<16x32xbf16>
        %c0_70 = arith.constant 0 : index
        %c0_71 = arith.constant 0 : index
        %132 = vector.load %arg5[%c0_70, %c0_71] : memref<32x96xbf16, #tpu.memory_space<vmem>>, vector<32x96xbf16>
        %cst_72 = arith.constant dense<0.000000e+00> : vector<16x96xf32>
        %133 = tpu.matmul %131, %132, %cst_72 {dimension_numbers = #tpu.dot_dimension_numbers<[1], [0], [0], [1], [0, 0, 1, 1], [], []>} : vector<16x32xbf16>, vector<32x96xbf16>, vector<16x96xf32> -> vector<16x96xf32>
        %c0_73 = arith.constant 0 : index
        %c0_74 = arith.constant 0 : index
        %134 = vector.load %arg6[%c0_73, %c0_74] : memref<1x96xf32, #tpu.memory_space<vmem>>, vector<1x96xf32>
        %135 = vector.broadcast %134 : vector<1x96xf32> to vector<16x96xf32>
        %136 = arith.addf %133, %135 : vector<16x96xf32>
        %137 = vector.extract_strided_slice %136 {offsets = [0, 0], sizes = [16, 8], strides = [1, 1]} : vector<16x96xf32> to vector<16x8xf32>
        %cst_75 = arith.constant 0.353553385 : f32
        %138 = vector.broadcast %cst_75 : f32 to vector<16x8xf32>
        %139 = arith.mulf %137, %138 : vector<16x8xf32>
        %140 = arith.truncf %139 : vector<16x8xf32> to vector<16x8xbf16>
        %c0_76 = arith.constant 0 : index
        %141 = arith.index_cast %103 : i32 to index
        %c0_77 = arith.constant 0 : index
        %142 = vector.load %arg17[%c0_76, %141, %c0_77] : memref<4x32x8xbf16, #tpu.memory_space<vmem>>, vector<1x16x8xbf16>
        %143 = vector.shape_cast %142 : vector<1x16x8xbf16> to vector<16x8xbf16>
        %144 = vector.shape_cast %140 : vector<16x8xbf16> to vector<1x16x8xbf16>
        tpu.vector_store %arg17[%c0_76, %141, %c0_77], %144 {strides = array<i32>} : memref<4x32x8xbf16, #tpu.memory_space<vmem>>, vector<1x16x8xbf16>,
        %145 = vector.extract_strided_slice %136 {offsets = [0, 32], sizes = [16, 8], strides = [1, 1]} : vector<16x96xf32> to vector<16x8xf32>
        %146 = arith.truncf %145 : vector<16x8xf32> to vector<16x8xbf16>
        %c0_78 = arith.constant 0 : index
        %147 = arith.index_cast %103 : i32 to index
        %c0_79 = arith.constant 0 : index
        %148 = vector.load %arg18[%c0_78, %147, %c0_79] : memref<4x32x8xbf16, #tpu.memory_space<vmem>>, vector<1x16x8xbf16>
        %149 = vector.shape_cast %148 : vector<1x16x8xbf16> to vector<16x8xbf16>
        %150 = vector.shape_cast %146 : vector<16x8xbf16> to vector<1x16x8xbf16>
        tpu.vector_store %arg18[%c0_78, %147, %c0_79], %150 {strides = array<i32>} : memref<4x32x8xbf16, #tpu.memory_space<vmem>>, vector<1x16x8xbf16>,
        %151 = vector.extract_strided_slice %136 {offsets = [0, 64], sizes = [16, 8], strides = [1, 1]} : vector<16x96xf32> to vector<16x8xf32>
        %152 = arith.truncf %151 : vector<16x8xf32> to vector<16x8xbf16>
        %c0_80 = arith.constant 0 : index
        %153 = arith.index_cast %103 : i32 to index
        %c0_81 = arith.constant 0 : index
        %154 = vector.load %arg19[%c0_80, %153, %c0_81] : memref<4x32x8xbf16, #tpu.memory_space<vmem>>, vector<1x16x8xbf16>
        %155 = vector.shape_cast %154 : vector<1x16x8xbf16> to vector<16x8xbf16>
        %156 = vector.shape_cast %152 : vector<16x8xbf16> to vector<1x16x8xbf16>
        tpu.vector_store %arg19[%c0_80, %153, %c0_81], %156 {strides = array<i32>} : memref<4x32x8xbf16, #tpu.memory_space<vmem>>, vector<1x16x8xbf16>,
        %157 = vector.extract_strided_slice %136 {offsets = [0, 8], sizes = [16, 8], strides = [1, 1]} : vector<16x96xf32> to vector<16x8xf32>
        %cst_82 = arith.constant 0.353553385 : f32
        %158 = vector.broadcast %cst_82 : f32 to vector<16x8xf32>
        %159 = arith.mulf %157, %158 : vector<16x8xf32>
        %160 = arith.truncf %159 : vector<16x8xf32> to vector<16x8xbf16>
        %c1 = arith.constant 1 : index
        %161 = arith.index_cast %103 : i32 to index
        %c0_83 = arith.constant 0 : index
        %162 = vector.load %arg17[%c1, %161, %c0_83] : memref<4x32x8xbf16, #tpu.memory_space<vmem>>, vector<1x16x8xbf16>
        %163 = vector.shape_cast %162 : vector<1x16x8xbf16> to vector<16x8xbf16>
        %164 = vector.shape_cast %160 : vector<16x8xbf16> to vector<1x16x8xbf16>
        tpu.vector_store %arg17[%c1, %161, %c0_83], %164 {strides = array<i32>} : memref<4x32x8xbf16, #tpu.memory_space<vmem>>, vector<1x16x8xbf16>,
        %165 = vector.extract_strided_slice %136 {offsets = [0, 40], sizes = [16, 8], strides = [1, 1]} : vector<16x96xf32> to vector<16x8xf32>
        %166 = arith.truncf %165 : vector<16x8xf32> to vector<16x8xbf16>
        %c1_84 = arith.constant 1 : index
        %167 = arith.index_cast %103 : i32 to index
        %c0_85 = arith.constant 0 : index
        %168 = vector.load %arg18[%c1_84, %167, %c0_85] : memref<4x32x8xbf16, #tpu.memory_space<vmem>>, vector<1x16x8xbf16>
        %169 = vector.shape_cast %168 : vector<1x16x8xbf16> to vector<16x8xbf16>
        %170 = vector.shape_cast %166 : vector<16x8xbf16> to vector<1x16x8xbf16>
        tpu.vector_store %arg18[%c1_84, %167, %c0_85], %170 {strides = array<i32>} : memref<4x32x8xbf16, #tpu.memory_space<vmem>>, vector<1x16x8xbf16>,
        %171 = vector.extract_strided_slice %136 {offsets = [0, 72], sizes = [16, 8], strides = [1, 1]} : vector<16x96xf32> to vector<16x8xf32>
        %172 = arith.truncf %171 : vector<16x8xf32> to vector<16x8xbf16>
        %c1_86 = arith.constant 1 : index
        %173 = arith.index_cast %103 : i32 to index
        %c0_87 = arith.constant 0 : index
        %174 = vector.load %arg19[%c1_86, %173, %c0_87] : memref<4x32x8xbf16, #tpu.memory_space<vmem>>, vector<1x16x8xbf16>
        %175 = vector.shape_cast %174 : vector<1x16x8xbf16> to vector<16x8xbf16>
        %176 = vector.shape_cast %172 : vector<16x8xbf16> to vector<1x16x8xbf16>
        tpu.vector_store %arg19[%c1_86, %173, %c0_87], %176 {strides = array<i32>} : memref<4x32x8xbf16, #tpu.memory_space<vmem>>, vector<1x16x8xbf16>,
        %177 = vector.extract_strided_slice %136 {offsets = [0, 16], sizes = [16, 8], strides = [1, 1]} : vector<16x96xf32> to vector<16x8xf32>
        %cst_88 = arith.constant 0.353553385 : f32
        %178 = vector.broadcast %cst_88 : f32 to vector<16x8xf32>
        %179 = arith.mulf %177, %178 : vector<16x8xf32>
        %180 = arith.truncf %179 : vector<16x8xf32> to vector<16x8xbf16>
        %c2 = arith.constant 2 : index
        %181 = arith.index_cast %103 : i32 to index
        %c0_89 = arith.constant 0 : index
        %182 = vector.load %arg17[%c2, %181, %c0_89] : memref<4x32x8xbf16, #tpu.memory_space<vmem>>, vector<1x16x8xbf16>
        %183 = vector.shape_cast %182 : vector<1x16x8xbf16> to vector<16x8xbf16>
        %184 = vector.shape_cast %180 : vector<16x8xbf16> to vector<1x16x8xbf16>
        tpu.vector_store %arg17[%c2, %181, %c0_89], %184 {strides = array<i32>} : memref<4x32x8xbf16, #tpu.memory_space<vmem>>, vector<1x16x8xbf16>,
        %185 = vector.extract_strided_slice %136 {offsets = [0, 48], sizes = [16, 8], strides = [1, 1]} : vector<16x96xf32> to vector<16x8xf32>
        %186 = arith.truncf %185 : vector<16x8xf32> to vector<16x8xbf16>
        %c2_90 = arith.constant 2 : index
        %187 = arith.index_cast %103 : i32 to index
        %c0_91 = arith.constant 0 : index
        %188 = vector.load %arg18[%c2_90, %187, %c0_91] : memref<4x32x8xbf16, #tpu.memory_space<vmem>>, vector<1x16x8xbf16>
        %189 = vector.shape_cast %188 : vector<1x16x8xbf16> to vector<16x8xbf16>
        %190 = vector.shape_cast %186 : vector<16x8xbf16> to vector<1x16x8xbf16>
        tpu.vector_store %arg18[%c2_90, %187, %c0_91], %190 {strides = array<i32>} : memref<4x32x8xbf16, #tpu.memory_space<vmem>>, vector<1x16x8xbf16>,
        %191 = vector.extract_strided_slice %136 {offsets = [0, 80], sizes = [16, 8], strides = [1, 1]} : vector<16x96xf32> to vector<16x8xf32>
        %192 = arith.truncf %191 : vector<16x8xf32> to vector<16x8xbf16>
        %c2_92 = arith.constant 2 : index
        %193 = arith.index_cast %103 : i32 to index
        %c0_93 = arith.constant 0 : index
        %194 = vector.load %arg19[%c2_92, %193, %c0_93] : memref<4x32x8xbf16, #tpu.memory_space<vmem>>, vector<1x16x8xbf16>
        %195 = vector.shape_cast %194 : vector<1x16x8xbf16> to vector<16x8xbf16>
        %196 = vector.shape_cast %192 : vector<16x8xbf16> to vector<1x16x8xbf16>
        tpu.vector_store %arg19[%c2_92, %193, %c0_93], %196 {strides = array<i32>} : memref<4x32x8xbf16, #tpu.memory_space<vmem>>, vector<1x16x8xbf16>,
        %197 = vector.extract_strided_slice %136 {offsets = [0, 24], sizes = [16, 8], strides = [1, 1]} : vector<16x96xf32> to vector<16x8xf32>
        %cst_94 = arith.constant 0.353553385 : f32
        %198 = vector.broadcast %cst_94 : f32 to vector<16x8xf32>
        %199 = arith.mulf %197, %198 : vector<16x8xf32>
        %200 = arith.truncf %199 : vector<16x8xf32> to vector<16x8xbf16>
        %c3 = arith.constant 3 : index
        %201 = arith.index_cast %103 : i32 to index
        %c0_95 = arith.constant 0 : index
        %202 = vector.load %arg17[%c3, %201, %c0_95] : memref<4x32x8xbf16, #tpu.memory_space<vmem>>, vector<1x16x8xbf16>
        %203 = vector.shape_cast %202 : vector<1x16x8xbf16> to vector<16x8xbf16>
        %204 = vector.shape_cast %200 : vector<16x8xbf16> to vector<1x16x8xbf16>
        tpu.vector_store %arg17[%c3, %201, %c0_95], %204 {strides = array<i32>} : memref<4x32x8xbf16, #tpu.memory_space<vmem>>, vector<1x16x8xbf16>,
        %205 = vector.extract_strided_slice %136 {offsets = [0, 56], sizes = [16, 8], strides = [1, 1]} : vector<16x96xf32> to vector<16x8xf32>
        %206 = arith.truncf %205 : vector<16x8xf32> to vector<16x8xbf16>
        %c3_96 = arith.constant 3 : index
        %207 = arith.index_cast %103 : i32 to index
        %c0_97 = arith.constant 0 : index
        %208 = vector.load %arg18[%c3_96, %207, %c0_97] : memref<4x32x8xbf16, #tpu.memory_space<vmem>>, vector<1x16x8xbf16>
        %209 = vector.shape_cast %208 : vector<1x16x8xbf16> to vector<16x8xbf16>
        %210 = vector.shape_cast %206 : vector<16x8xbf16> to vector<1x16x8xbf16>
        tpu.vector_store %arg18[%c3_96, %207, %c0_97], %210 {strides = array<i32>} : memref<4x32x8xbf16, #tpu.memory_space<vmem>>, vector<1x16x8xbf16>,
        %211 = vector.extract_strided_slice %136 {offsets = [0, 88], sizes = [16, 8], strides = [1, 1]} : vector<16x96xf32> to vector<16x8xf32>
        %212 = arith.truncf %211 : vector<16x8xf32> to vector<16x8xbf16>
        %c3_98 = arith.constant 3 : index
        %213 = arith.index_cast %103 : i32 to index
        %c0_99 = arith.constant 0 : index
        %214 = vector.load %arg19[%c3_98, %213, %c0_99] : memref<4x32x8xbf16, #tpu.memory_space<vmem>>, vector<1x16x8xbf16>
        %215 = vector.shape_cast %214 : vector<1x16x8xbf16> to vector<16x8xbf16>
        %216 = vector.shape_cast %212 : vector<16x8xbf16> to vector<1x16x8xbf16>
        tpu.vector_store %arg19[%c3_98, %213, %c0_99], %216 {strides = array<i32>} : memref<4x32x8xbf16, #tpu.memory_space<vmem>>, vector<1x16x8xbf16>,
      }
      %c2_i32_55 = arith.constant 2 : i32
    } else {
    }
    %c16_i32 = arith.constant 16 : i32
    %3 = arith.muli %arg1, %c16_i32 : i32
    %4 = tpu.assume_multiple %3, 16 : i32
    %c0 = arith.constant 0 : index
    %5 = arith.index_cast %4 : i32 to index
    %c0_1 = arith.constant 0 : index
    %6 = vector.load %arg2[%c0, %5, %c0_1] : memref<1x32x32xf32, #tpu.memory_space<vmem>>, vector<1x16x32xf32>
    %7 = vector.shape_cast %6 : vector<1x16x32xf32> to vector<16x32xf32>
    %c0_2 = arith.constant 0 : index
    %8 = arith.index_cast %4 : i32 to index
    %c0_3 = arith.constant 0 : index
    %9 = vector.load %arg17[%c0_2, %8, %c0_3] : memref<4x32x8xbf16, #tpu.memory_space<vmem>>, vector<4x16x8xbf16>
    %c0_4 = arith.constant 0 : index
    %c0_5 = arith.constant 0 : index
    %c0_6 = arith.constant 0 : index
    %10 = vector.load %arg18[%c0_4, %c0_5, %c0_6] : memref<4x32x8xbf16, #tpu.memory_space<vmem>>, vector<4x32x8xbf16>
    %c0_7 = arith.constant 0 : index
    %c0_8 = arith.constant 0 : index
    %c0_9 = arith.constant 0 : index
    %11 = vector.load %arg19[%c0_7, %c0_8, %c0_9] : memref<4x32x8xbf16, #tpu.memory_space<vmem>>, vector<4x32x8xbf16>
    "tpu.trace_start"() <{level = 10 : i32, message = "hqd,hkd->hqk"}> : () -> ()
    %cst = arith.constant dense<0.000000e+00> : vector<4x16x32xf32>
    %12 = tpu.matmul %9, %10, %cst {dimension_numbers = #tpu.dot_dimension_numbers<[2], [2], [1], [1], [0, 0, 0, 1, 1, 1], [0], [0]>} : vector<4x16x8xbf16>, vector<4x32x8xbf16>, vector<4x16x32xf32> -> vector<4x16x32xf32>
    "tpu.trace_stop"() : () -> ()
    %c0_10 = arith.constant 0 : index
    %c0_11 = arith.constant 0 : index
    %c0_12 = arith.constant 0 : index
    %c0_13 = arith.constant 0 : index
    %13 = vector.load %arg16[%c0_10, %c0_11, %c0_12, %c0_13] : memref<1x4x16x32xf32, #tpu.memory_space<vmem>>, vector<1x4x16x32xf32>
    %14 = vector.shape_cast %13 : vector<1x4x16x32xf32> to vector<4x16x32xf32>
    %15 = vector.shape_cast %12 : vector<4x16x32xf32> to vector<1x4x16x32xf32>
    tpu.vector_store %arg16[%c0_10, %c0_11, %c0_12, %c0_13], %15 {strides = array<i32>} : memref<1x4x16x32xf32, #tpu.memory_space<vmem>>, vector<1x4x16x32xf32>,
    %cst_14 = arith.constant dense<0xFF800000> : vector<4x16xf32>
    %16 = vector.multi_reduction <maximumf>, %12, %cst_14 [2] : vector<4x16x32xf32> to vector<4x16xf32>
    %17 = vector.shape_cast %16 : vector<4x16xf32> to vector<4x16x1xf32>
    %18 = vector.broadcast %17 : vector<4x16x1xf32> to vector<4x16x32xf32>
    %19 = arith.subf %12, %18 : vector<4x16x32xf32>
    %20 = math.exp %19 : vector<4x16x32xf32>
    %cst_15 = arith.constant dense<0.000000e+00> : vector<4x16xf32>
    %21 = vector.multi_reduction <add>, %20, %cst_15 [2] : vector<4x16x32xf32> to vector<4x16xf32>
    %22 = vector.shape_cast %21 : vector<4x16xf32> to vector<4x16x1xf32>
    %23 = tpu.reciprocal %22 {approx = true} : vector<4x16x1xf32> -> vector<4x16x1xf32>
    %24 = vector.broadcast %23 : vector<4x16x1xf32> to vector<4x16x32xf32>
    %25 = arith.mulf %20, %24 : vector<4x16x32xf32>
    %26 = arith.truncf %25 : vector<4x16x32xf32> to vector<4x16x32xbf16>
    "tpu.trace_start"() <{level = 10 : i32, message = "hqk,hkd->hqd"}> : () -> ()
    %cst_16 = arith.constant dense<0.000000e+00> : vector<4x16x8xf32>
    %27 = tpu.matmul %26, %11, %cst_16 {dimension_numbers = #tpu.dot_dimension_numbers<[2], [1], [1], [2], [0, 0, 0, 1, 1, 2], [0], [0]>} : vector<4x16x32xbf16>, vector<4x32x8xbf16>, vector<4x16x8xf32> -> vector<4x16x8xf32>
    "tpu.trace_stop"() : () -> ()
    %28 = vector.extract_strided_slice %27 {offsets = [0, 0, 0], sizes = [1, 16, 8], strides = [1, 1, 1]} : vector<4x16x8xf32> to vector<1x16x8xf32>
    %29 = vector.shape_cast %28 : vector<1x16x8xf32> to vector<16x8xf32>
    %30 = arith.truncf %29 : vector<16x8xf32> to vector<16x8xbf16>
    %c0_17 = arith.constant 0 : index
    %c0_18 = arith.constant 0 : index
    %31 = vector.load %arg20[%c0_17, %c0_18] : memref<16x32xbf16, #tpu.memory_space<vmem>>, vector<16x8xbf16>
    tpu.vector_store %arg20[%c0_17, %c0_18], %30 {strides = array<i32>} : memref<16x32xbf16, #tpu.memory_space<vmem>>, vector<16x8xbf16>,
    %32 = vector.extract_strided_slice %27 {offsets = [1, 0, 0], sizes = [1, 16, 8], strides = [1, 1, 1]} : vector<4x16x8xf32> to vector<1x16x8xf32>
    %33 = vector.shape_cast %32 : vector<1x16x8xf32> to vector<16x8xf32>
    %34 = arith.truncf %33 : vector<16x8xf32> to vector<16x8xbf16>
    %c0_19 = arith.constant 0 : index
    %c8 = arith.constant 8 : index
    %35 = vector.load %arg20[%c0_19, %c8] : memref<16x32xbf16, #tpu.memory_space<vmem>>, vector<16x8xbf16>
    tpu.vector_store %arg20[%c0_19, %c8], %34 {strides = array<i32>} : memref<16x32xbf16, #tpu.memory_space<vmem>>, vector<16x8xbf16>,
    %36 = vector.extract_strided_slice %27 {offsets = [2, 0, 0], sizes = [1, 16, 8], strides = [1, 1, 1]} : vector<4x16x8xf32> to vector<1x16x8xf32>
    %37 = vector.shape_cast %36 : vector<1x16x8xf32> to vector<16x8xf32>
    %38 = arith.truncf %37 : vector<16x8xf32> to vector<16x8xbf16>
    %c0_20 = arith.constant 0 : index
    %c16 = arith.constant 16 : index
    %39 = vector.load %arg20[%c0_20, %c16] : memref<16x32xbf16, #tpu.memory_space<vmem>>, vector<16x8xbf16>
    tpu.vector_store %arg20[%c0_20, %c16], %38 {strides = array<i32>} : memref<16x32xbf16, #tpu.memory_space<vmem>>, vector<16x8xbf16>,
    %40 = vector.extract_strided_slice %27 {offsets = [3, 0, 0], sizes = [1, 16, 8], strides = [1, 1, 1]} : vector<4x16x8xf32> to vector<1x16x8xf32>
    %41 = vector.shape_cast %40 : vector<1x16x8xf32> to vector<16x8xf32>
    %42 = arith.truncf %41 : vector<16x8xf32> to vector<16x8xbf16>
    %c0_21 = arith.constant 0 : index
    %c24 = arith.constant 24 : index
    %43 = vector.load %arg20[%c0_21, %c24] : memref<16x32xbf16, #tpu.memory_space<vmem>>, vector<16x8xbf16>
    tpu.vector_store %arg20[%c0_21, %c24], %42 {strides = array<i32>} : memref<16x32xbf16, #tpu.memory_space<vmem>>, vector<16x8xbf16>,
    %c0_22 = arith.constant 0 : index
    %c0_23 = arith.constant 0 : index
    %44 = vector.load %arg20[%c0_22, %c0_23] : memref<16x32xbf16, #tpu.memory_space<vmem>>, vector<16x32xbf16>
    %c0_24 = arith.constant 0 : index
    %c0_25 = arith.constant 0 : index
    %45 = vector.load %arg7[%c0_24, %c0_25] : memref<32x32xbf16, #tpu.memory_space<vmem>>, vector<32x32xbf16>
    %cst_26 = arith.constant dense<0.000000e+00> : vector<16x32xf32>
    %46 = tpu.matmul %44, %45, %cst_26 {dimension_numbers = #tpu.dot_dimension_numbers<[1], [0], [0], [1], [0, 0, 1, 1], [], []>} : vector<16x32xbf16>, vector<32x32xbf16>, vector<16x32xf32> -> vector<16x32xf32>
    %c0_27 = arith.constant 0 : index
    %c0_28 = arith.constant 0 : index
    %47 = vector.load %arg8[%c0_27, %c0_28] : memref<1x32xf32, #tpu.memory_space<vmem>>, vector<1x32xf32>
    %48 = vector.broadcast %47 : vector<1x32xf32> to vector<16x32xf32>
    %49 = arith.addf %46, %48 : vector<16x32xf32>
    %50 = arith.addf %7, %49 : vector<16x32xf32>
    %cst_29 = arith.constant dense<0.000000e+00> : vector<16xf32>
    %51 = vector.multi_reduction <add>, %50, %cst_29 [1] : vector<16x32xf32> to vector<16xf32>
    %52 = vector.shape_cast %51 : vector<16xf32> to vector<16x1xf32>
    %cst_30 = arith.constant 3.200000e+01 : f32
    %53 = vector.broadcast %cst_30 : f32 to vector<16x1xf32>
    %54 = arith.divf %52, %53 : vector<16x1xf32>
    %55 = vector.broadcast %54 : vector<16x1xf32> to vector<16x32xf32>
    %56 = arith.subf %50, %55 : vector<16x32xf32>
    %57 = arith.mulf %56, %56 : vector<16x32xf32>
    %cst_31 = arith.constant dense<0.000000e+00> : vector<16xf32>
    %58 = vector.multi_reduction <add>, %57, %cst_31 [1] : vector<16x32xf32> to vector<16xf32>
    %59 = vector.shape_cast %58 : vector<16xf32> to vector<16x1xf32>
    %cst_32 = arith.constant 3.200000e+01 : f32
    %60 = vector.broadcast %cst_32 : f32 to vector<16x1xf32>
    %61 = arith.divf %59, %60 : vector<16x1xf32>
    %62 = vector.broadcast %54 : vector<16x1xf32> to vector<16x32xf32>
    %63 = arith.subf %50, %62 : vector<16x32xf32>
    %cst_33 = arith.constant 9.99999974E-6 : f32
    %64 = vector.broadcast %cst_33 : f32 to vector<16x1xf32>
    %65 = arith.addf %61, %64 : vector<16x1xf32>
    %66 = math.rsqrt %65 : vector<16x1xf32>
    %67 = vector.broadcast %66 : vector<16x1xf32> to vector<16x32xf32>
    %68 = arith.mulf %63, %67 : vector<16x32xf32>
    %c0_34 = arith.constant 0 : index
    %c0_35 = arith.constant 0 : index
    %69 = vector.load %arg9[%c0_34, %c0_35] : memref<1x32xf32, #tpu.memory_space<vmem>>, vector<1x32xf32>
    %70 = vector.broadcast %69 : vector<1x32xf32> to vector<16x32xf32>
    %71 = arith.mulf %68, %70 : vector<16x32xf32>
    %c0_36 = arith.constant 0 : index
    %c0_37 = arith.constant 0 : index
    %72 = vector.load %arg10[%c0_36, %c0_37] : memref<1x32xf32, #tpu.memory_space<vmem>>, vector<1x32xf32>
    %73 = vector.broadcast %72 : vector<1x32xf32> to vector<16x32xf32>
    %74 = arith.addf %71, %73 : vector<16x32xf32>
    %75 = arith.truncf %74 : vector<16x32xf32> to vector<16x32xbf16>
    %c0_38 = arith.constant 0 : index
    %c0_39 = arith.constant 0 : index
    %76 = vector.load %arg11[%c0_38, %c0_39] : memref<32x128xbf16, #tpu.memory_space<vmem>>, vector<32x128xbf16>
    %cst_40 = arith.constant dense<0.000000e+00> : vector<16x128xf32>
    %77 = tpu.matmul %75, %76, %cst_40 {dimension_numbers = #tpu.dot_dimension_numbers<[1], [0], [0], [1], [0, 0, 1, 1], [], []>} : vector<16x32xbf16>, vector<32x128xbf16>, vector<16x128xf32> -> vector<16x128xf32>
    %c0_41 = arith.constant 0 : index
    %c0_42 = arith.constant 0 : index
    %78 = vector.load %arg12[%c0_41, %c0_42] : memref<1x128xf32, #tpu.memory_space<vmem>>, vector<1x128xf32>
    %79 = vector.broadcast %78 : vector<1x128xf32> to vector<16x128xf32>
    %80 = arith.addf %77, %79 : vector<16x128xf32>
    %cst_43 = arith.constant 5.000000e-01 : f32
    %81 = vector.broadcast %cst_43 : f32 to vector<16x128xf32>
    %82 = arith.mulf %81, %80 : vector<16x128xf32>
    %cst_44 = arith.constant 0.707106769 : f32
    %83 = vector.broadcast %cst_44 : f32 to vector<16x128xf32>
    %84 = arith.mulf %80, %83 : vector<16x128xf32>
    %85 = math.erf %84 : vector<16x128xf32>
    %cst_45 = arith.constant 1.000000e+00 : f32
    %86 = vector.broadcast %cst_45 : f32 to vector<16x128xf32>
    %87 = arith.addf %86, %85 : vector<16x128xf32>
    %88 = arith.mulf %82, %87 : vector<16x128xf32>
    %89 = arith.truncf %88 : vector<16x128xf32> to vector<16x128xbf16>
    %c0_46 = arith.constant 0 : index
    %c0_47 = arith.constant 0 : index
    %90 = vector.load %arg13[%c0_46, %c0_47] : memref<128x32xbf16, #tpu.memory_space<vmem>>, vector<128x32xbf16>
    %cst_48 = arith.constant dense<0.000000e+00> : vector<16x32xf32>
    %91 = tpu.matmul %89, %90, %cst_48 {dimension_numbers = #tpu.dot_dimension_numbers<[1], [0], [0], [1], [0, 0, 1, 1], [], []>} : vector<16x128xbf16>, vector<128x32xbf16>, vector<16x32xf32> -> vector<16x32xf32>
    %c0_49 = arith.constant 0 : index
    %c0_50 = arith.constant 0 : index
    %92 = vector.load %arg14[%c0_49, %c0_50] : memref<1x32xf32, #tpu.memory_space<vmem>>, vector<1x32xf32>
    %93 = vector.broadcast %92 : vector<1x32xf32> to vector<16x32xf32>
    %94 = arith.addf %91, %93 : vector<16x32xf32>
    %95 = arith.addf %50, %94 : vector<16x32xf32>
    %c0_51 = arith.constant 0 : index
    %c0_52 = arith.constant 0 : index
    %c0_53 = arith.constant 0 : index
    %96 = vector.load %arg15[%c0_51, %c0_52, %c0_53] : memref<1x16x32xf32, #tpu.memory_space<vmem>>, vector<1x16x32xf32>
    %97 = vector.shape_cast %96 : vector<1x16x32xf32> to vector<16x32xf32>
    %98 = vector.shape_cast %95 : vector<16x32xf32> to vector<1x16x32xf32>
    tpu.vector_store %arg15[%c0_51, %c0_52, %c0_53], %98 {strides = array<i32>} : memref<1x16x32xf32, #tpu.memory_space<vmem>>, vector<1x16x32xf32>,
    return
  }
  func.func @transform_0(%arg0: i32, %arg1: i32) -> (i32, i32, i32) {
    %c0_i32 = arith.constant 0 : i32
    %c0_i32_0 = arith.constant 0 : i32
    %c0_i32_1 = arith.constant 0 : i32
    return %arg0, %c0_i32, %c0_i32_0 : i32, i32, i32
  }
  func.func @transform_1(%arg0: i32, %arg1: i32) -> (i32, i32) {
    %c0_i32 = arith.constant 0 : i32
    %c0_i32_0 = arith.constant 0 : i32
    %c0_i32_1 = arith.constant 0 : i32
    return %c0_i32, %c0_i32_0 : i32, i32
  }
  func.func @transform_2(%arg0: i32, %arg1: i32) -> (i32, i32) {
    %c0_i32 = arith.constant 0 : i32
    %c0_i32_0 = arith.constant 0 : i32
    %c0_i32_1 = arith.constant 0 : i32
    return %c0_i32, %c0_i32_0 : i32, i32
  }
  func.func @transform_3(%arg0: i32, %arg1: i32) -> (i32, i32) {
    %c0_i32 = arith.constant 0 : i32
    %c0_i32_0 = arith.constant 0 : i32
    %c0_i32_1 = arith.constant 0 : i32
    return %c0_i32, %c0_i32_0 : i32, i32
  }
  func.func @transform_4(%arg0: i32, %arg1: i32) -> (i32, i32) {
    %c0_i32 = arith.constant 0 : i32
    %c0_i32_0 = arith.constant 0 : i32
    %c0_i32_1 = arith.constant 0 : i32
    return %c0_i32, %c0_i32_0 : i32, i32
  }
  func.func @transform_5(%arg0: i32, %arg1: i32) -> (i32, i32) {
    %c0_i32 = arith.constant 0 : i32
    %c0_i32_0 = arith.constant 0 : i32
    %c0_i32_1 = arith.constant 0 : i32
    return %c0_i32, %c0_i32_0 : i32, i32
  }
  func.func @transform_6(%arg0: i32, %arg1: i32) -> (i32, i32) {
    %c0_i32 = arith.constant 0 : i32
    %c0_i32_0 = arith.constant 0 : i32
    %c0_i32_1 = arith.constant 0 : i32
    return %c0_i32, %c0_i32_0 : i32, i32
  }
  func.func @transform_7(%arg0: i32, %arg1: i32) -> (i32, i32) {
    %c0_i32 = arith.constant 0 : i32
    %c0_i32_0 = arith.constant 0 : i32
    %c0_i32_1 = arith.constant 0 : i32
    return %c0_i32, %c0_i32_0 : i32, i32
  }
  func.func @transform_8(%arg0: i32, %arg1: i32) -> (i32, i32) {
    %c0_i32 = arith.constant 0 : i32
    %c0_i32_0 = arith.constant 0 : i32
    %c0_i32_1 = arith.constant 0 : i32
    return %c0_i32, %c0_i32_0 : i32, i32
  }
  func.func @transform_9(%arg0: i32, %arg1: i32) -> (i32, i32) {
    %c0_i32 = arith.constant 0 : i32
    %c0_i32_0 = arith.constant 0 : i32
    %c0_i32_1 = arith.constant 0 : i32
    return %c0_i32, %c0_i32_0 : i32, i32
  }
  func.func @transform_10(%arg0: i32, %arg1: i32) -> (i32, i32) {
    %c0_i32 = arith.constant 0 : i32
    %c0_i32_0 = arith.constant 0 : i32
    %c0_i32_1 = arith.constant 0 : i32
    return %c0_i32, %c0_i32_0 : i32, i32
  }
  func.func @transform_11(%arg0: i32, %arg1: i32) -> (i32, i32) {
    %c0_i32 = arith.constant 0 : i32
    %c0_i32_0 = arith.constant 0 : i32
    %c0_i32_1 = arith.constant 0 : i32
    return %c0_i32, %c0_i32_0 : i32, i32
  }
  func.func @transform_12(%arg0: i32, %arg1: i32) -> (i32, i32) {
    %c0_i32 = arith.constant 0 : i32
    %c0_i32_0 = arith.constant 0 : i32
    %c0_i32_1 = arith.constant 0 : i32
    return %c0_i32, %c0_i32_0 : i32, i32
  }
  func.func @transform_13(%arg0: i32, %arg1: i32) -> (i32, i32, i32) {
    %c0_i32 = arith.constant 0 : i32
    %c0_i32_0 = arith.constant 0 : i32
    return %arg0, %arg1, %c0_i32 : i32, i32, i32
  }
  func.func @transform_14(%arg0: i32, %arg1: i32) -> (i32, i32, i32, i32) {
    %c0_i32 = arith.constant 0 : i32
    %c0_i32_0 = arith.constant 0 : i32
    %c0_i32_1 = arith.constant 0 : i32
    return %arg0, %c0_i32, %arg1, %c0_i32_0 : i32, i32, i32, i32
  }
}

</mosaic_0001>

<bundles_post_ra>
// kernel: tpu_custom_call.1
= control target key start
LH: loop header
LB: loop body
LE: loop exit
PB: predicated region body
PF: predicated region fallthrough
CT: control target
= control target key end

     0   :  { %s3077_s0 = inlined_call_operand.vmem [shape: f32[2,32,32], index: 0, kind: input, shape index: {}]   ;;  %s3078_s1 = inlined_call_operand.hbm [shape: f32[1,32], index: 1, kind: input, shape index: {}]   ;;  %s3079_s2 = inlined_call_operand.vmem [shape: f32[1,32], index: 2, kind: input, shape index: {}]   ;;  %s3080_s3 = inlined_call_operand.vmem [shape: bf16[32,96], index: 3, kind: input, shape index: {}]   ;;  %s3081_s4 = inlined_call_operand.vmem [shape: f32[1,96], index: 4, kind: input, shape index: {}]   ;;  %s3082_s5 = inlined_call_operand.hbm [shape: bf16[32,32], index: 5, kind: input, shape index: {}]   ;;  %s3083_s6 = inlined_call_operand.vmem [shape: f32[1,32], index: 6, kind: input, shape index: {}]   ;;  %s3084_s7 = inlined_call_operand.vmem [shape: f32[1,32], index: 7, kind: input, shape index: {}]   ;;  %s3085_s8 = inlined_call_operand.vmem [shape: f32[1,32], index: 8, kind: input, shape index: {}]   ;;  %s3086_s9 = inlined_call_operand.hbm [shape: bf16[32,128], index: 9, kind: input, shape index: {}]   ;;  %s3087_s10 = inlined_call_operand.vmem [shape: f32[1,128], index: 10, kind: input, shape index: {}]   ;;  %s3088_s11 = inlined_call_operand.vmem [shape: bf16[128,32], index: 11, kind: input, shape index: {}]   ;;  %s3089_s12 = inlined_call_operand.vmem [shape: f32[1,32], index: 12, kind: input, shape index: {}]   ;;  %s3090_s13 = inlined_call_operand.hbm [shape: f32[2,32,32], index: 13, kind: output, shape index: {0}]   ;;  %s3091_s14 = inlined_call_operand.hbm [shape: f32[2,4,32,32], index: 14, kind: output, shape index: {1}]  }
   0x1   :  { %3105 = sst [smem:[#allocation31_spill]] %s3077_s0 }
   0x2   :  { %3106 = sst [smem:[#allocation32_spill]] %s3082_s5 }
   0x3   :  { %3107 = sst [smem:[#allocation33_spill]] %s3089_s12 }
   0x4   :  { %3108 = sst [smem:[#allocation34_spill]] %s3090_s13 }
   0x5   :  { %3109 = sst [smem:[#allocation35_spill]] %s3091_s14 }
   0x6   :  { %20 = vsyncpa [#allocation7], 0 }
   0x7   :  { %21 = vsyncpa [#allocation10], 0 }
   0x8   :  { %22 = vsyncpa [#allocation8], 0 }
   0x9   :  { %24 = vsyncpa [#allocation8 + $0x1], 0 }
   0xa   :  { %25 = vsyncpa [#allocation14], 0 }
   0xb   :  { %27 = vsyncpa [#allocation14 + $0x1], 0  ;;  %s2611_s29 = smov 0   ;;  %s2613_s30 = smov 0  }
   0xc   :  { %s2615_s15 = smov 0   ;;  %s2617_s16 = smov 0  }
   0xd   :  { %s2619_s17 = smov 0   ;;  %s2621_s18 = smov 0  }
   0xe   :  { %s2623_s19 = smov 0   ;;  %s2625_s20 = smov 0  }
   0xf LB: > { %3110 = sst [smem:[#allocation21_spill]] %s2473_s29  ;;  %s1850_s21 = sadd.s32 4294967295, %s2501_s20   ;;  %s2501_s20 = sphi %s2625_s20, %s33_s20   ;;  %s2497_s19 = sphi %s2623_s19, %s3140_s19   ;;  %s2493_s18 = sphi %s2621_s18, %s3139_s18   ;;  %s2489_s17 = sphi %s2619_s17, %s3138_s17   ;;  %s2485_s16 = sphi %s2617_s16, %s3137_s16   ;;  %s2481_s15 = sphi %s2615_s15, %s3136_s15   ;;  %s2477_s30 = sphi %s2613_s30, %s3142_s30   ;;  %s2473_s29 = sphi %s2611_s29, %s3141_s29  }
  0x10   : > { %3111 = sst [smem:[#allocation22_spill]] %s2481_s15  ;;  %s1851_s22 = sadd.s32 4294967294, %s2501_s20  }
  0x11   : > { %3112 = sst [smem:[#allocation23_spill]] %s2493_s18  ;;  %s42_s23 = sadd.s32 1, %s2493_s18 }
  0x12   : > { %3113 = sst [smem:[#allocation24_spill]] %s2497_s19  ;;  %s45_s24 = sadd.s32 1, %s2497_s19 }
  0x13   : > { %3114 = sst [smem:[#allocation25_spill]] %s2501_s20  ;;  %p43_p0 = scmp.ge.s32.totalorder %s42_s23, 2 }
  0x14   : > { %s332_s25 = sadd.s32 1, %s2481_s15  ;;  %p342_p1 = scmp.ne.s32.totalorder %s2481_s15, %s2477_s30 }
  0x15   : > { %p343_p2 = scmp.eq.s32.totalorder %s1850_s21, 3  ;;  %s3144_s23 = smov (%p43_p0, %s42_s23), 0 }
  0x16   : > { %3115 = sst [smem:[#allocation26_spill]] %s3144_s23  ;;  %s3146_s24 = smov (!%p43_p0, %s45_s24), %s2497_s19 }
  0x17   : > { %s328_s26 = ssub.s32 %s2493_s18, %s3144_s23  ;;  %p2663_p3 = por %p343_p2, %p342_p1 }
  0x18   : > { %p47_p4 = scmp.ge.s32.totalorder %s3146_s24, 2  ;;  %p348_p5 = scmp.ne.s32.totalorder %s2477_s30, %s2473_s29 }
  0x19   : > { %s3116_s27 = scalar_select %p2663_p3, 1, 0 }
  0x1a   : > { %p349_p6 = scmp.eq.s32.totalorder %s1851_s22, 3  ;;  %p1852_p7 = scmp.ge.s32.totalorder %s2501_s20, 1 }
  0x1b   : > { %3117 = sst [smem:[#allocation27_spill]] %s3116_s27  ;;  %s3148_s24 = smov (%p47_p4, %s3146_s24), 0 }
  0x1c   : > { %3118 = sst [smem:[#allocation28_spill]] %s3148_s24  ;;  %p2672_p8 = por %p349_p6, %p348_p5 }
  0x1d   : > { %p384_p9 = scmp.lt.s32.totalorder %s2501_s20, 5  ;;  %s327_s14 = ssub.s32 %s2497_s19, %s3148_s24 }
  0x1e   : > { %s3119_s28 = scalar_select %p2672_p8, 1, 0 }
  0x1f   : > { %s329_s13 = sor.u32 %s328_s26, %s327_s14  ;;  %p2679_p10 = pnand %p1852_p7, %p384_p9 }
  0x20   : > { %3120 = sst [smem:[#allocation29_spill]] %s3119_s28  ;;  %p330_p11 = scmp.eq.s32.totalorder %s329_s13, 0 }
  0x21   : > { %p2683_p12 = scmp.eq.s32.totalorder %s1850_s21, 0  ;;  %p2120_p13 = pneg %p2679_p10 }
  0x22   : > { %s3123_s5 = sld [smem:[#allocation32_spill]]  ;;  %s2507_s13 = smov [#allocation9]  }
  0x23   : > { %s2693_s20 = scalar_select %p330_p11, %s2481_s15, %s332_s25  }
  0x24   : > { %p2697_p0 = pnand %p2683_p12, %p2120_p13  ;;  %s418_s21 = sshll.u32 %s2507_s13, 4  ;;  %s419_s21 = int_to_ptr.vmem [resolvable:$true] %s418_s21 }
  0x25   : > { %3124 = sst [smem:[#allocation30_spill]] %s2693_s20  ;;  %s2508_s26 = smov 64  }
  0x26   : > { %s2509_s24 = smov 4   ;;  %s396_s25 = sshll.u32 %s3078_s1, 4  ;;  %s397_s25 = int_to_ptr.hbm [resolvable:$true] %s396_s25 }
  0x27   : > { %s439_s27 = sshll.u32 %s3086_s9, 4  ;;  %s2511_s13 = smov [#allocation11]   ;;  %s440_s27 = int_to_ptr.hbm [resolvable:$true] %s439_s27 }
  0x28   : > { %s416_s28 = sshll.u32 %s3123_s5, 4  ;;  %s2510_s5 = smov [#allocation6]   ;;  %s417_s28 = int_to_ptr.hbm [resolvable:$true] %s416_s28 }
  0x29   : > { %2126 = dma.hbm_to_vmem [thread:$0]  (!%p2697_p0), %s417_s28, 256, %s419_s21, [#allocation10], %s2508_s26, %s2508_s26, %s2509_s24  }
  0x2a   : > { %s398_s19 = sshll.u32 %s2510_s5, 4  ;;  %s441_s12 = sshll.u32 %s2511_s13, 4  ;;  %s399_s19 = int_to_ptr.vmem [resolvable:$true] %s398_s19  ;;  %s442_s12 = int_to_ptr.vmem [resolvable:$true] %s441_s12 }
  0x2b   : > { %2123 = dma.hbm_to_vmem [thread:$0]  (!%p2697_p0), %s397_s25, 16, %s399_s19, [#allocation7]  }
  0x2c   : > { %2129 = dma.hbm_to_vmem [thread:$0]  (!%p2697_p0), %s440_s27, 256, %s442_s12, [#allocation10], %s2508_s26, %s2508_s26, %s2509_s24  }
  0x2d   : > { %474 = sbr.rel (%p2679_p10) target bundleno = 2095 (0x82f), region = 72 }
  0x32   : > { %2456 = dma.done.wait (%p2683_p12), [#allocation7], 16  }
  0x33   : > { %2458 = vsyncadd (%p2683_p12), [#allocation7], 4294967280 }
  0x34   : > { %2460 = dma.done.wait (%p2683_p12), [#allocation10], 512  }
  0x35   : > { %2462 = vsyncadd (%p2683_p12), [#allocation10], 4294966784  ;;  %s2724_s5 = sand.u32 1, %s2477_s30   ;;  %p536_p1 = scmp.lt.s32.totalorder %s2489_s17, 1 }
  0x36   : > { %s1861_s12 = sshll.u32 %s2724_s5, 4  ;;  %s1862_s15 = sshll.u32 %s2724_s5, 6 }
  0x37   : > { %s537_s19 = scalar_select %p536_p1, %s2489_s17, 1 }
  0x38   : > { %s3126_s0 = sld [smem:[#allocation31_spill]]  ;;  %s2735_s28 = scalar_lea.vmem [#allocation12], %s1861_s12 }
  0x39   : > { %s2062_s20 = sshll.u32 %s537_s19, 5  ;;  %s2737_s18 = scalar_lea.vmem [#allocation13], %s1862_s15 }
  0x3a   : > { %p1865_p2 = scmp.ne.s32.totalorder %s2485_s16, 0 }
  0x3b   : > { %s2740_s14 = smov (!%p1865_p2), 0  }
  0x3c   : > { %547 = sbr.rel (%p1865_p2) target bundleno = 641 (0x281), region = 88 }
  0x3e   : > { %s2733_s27 = scalar_lea.vmem %s3126_s0, %s2062_s20 }
  0x41 LB: >> { %s1866_s21 = sshll.u32 %s2505_s14, 4  ;;  %vm558_vm0 = vcmask 261120   ;;  %v2512_v4 = vmov 32.0   ;;  %v2064_v21 = vld [vmem:[%s3080_s3 + $0x8] sm:$0xff]  ;;  %v2063_v23 = vld [vmem:[%s3080_s3] sm:$0xff]  ;;  %vm668_vm8 = vcmask 60416   ;;  %s2505_s14 = sphi %s2740_s14, %s553_s14  }
  0x42   : >> { %s555_s26 = scalar_lea.vmem %s2733_s27, %s1866_s21  ;;  %2248 = vrcp.f32 %v2512_v4  ;;  %652 = vmatpush.bf16.msra.mxu0 %v2064_v21  ;;  %v2245_v42 = vld [vmem:[#allocation6] ss:$0 sm:$0xff]  ;;  %v2246_v47 = vld [vmem:[%s3079_s2] ss:$0 sm:$0xff]  ;;  %s664_s23 = sshra.s32 %s1866_s21, 3 }
  0x43   : >> { %v556_v0 = vld [vmem:[%s555_s26] sm:$0xff]  ;;  %v557_v2 = vld [vmem:[%s555_s26 + $0x8] sm:$0xff]  ;;  %s2768_s24 = sshll.u32 %s664_s23, 2  ;;  %s2513_s26 = smov 80  }
  0x44   : >> { %v559_v1 = vsel %vm558_vm0, %v556_v0, 0.0  ;;  %v562_v3 = vsel %vm558_vm0, %v557_v2, 0.0  ;;  %v2247_v52 = vld [vmem:[%s3081_s4] ss:$0 sm:$0xff]  ;;  %s2514_s29 = smov 64   ;;  %s3104_s22 = smov 96  }
  0x45   : >> { %560 = vadd.xlane.f32.xlu0 %v559_v1  ;;  %s2773_s25 = scalar_lea.vmem [#allocation2], %s2768_s24  ;;  %s2516_s21 = smov 72  }
  0x46   : >> { %653 = vmatpush.bf16.msra.mxu0 %v2063_v23  ;;  %s2517_s13 = smov 112   ;;  %s2518_s12 = smov 88  }
  0x47   : >> { %s2519_s15 = smov 104   ;;  %s2520_s19 = smov 56  }
  0x48   : >> { %v2249_v5 = vpop.eup %2248  ;;  %s2521_s20 = smov 48   ;;  %s2522_s23 = smov 120  }
  0x49   : >> { %v566_v6 = vmul.f32 32.0, %v2249_v5  ;;  %vm570_vm1 = vweird.f32 %v2249_v5  ;;  %s3127_s0 = smov 96   ;;  %s553_s14 = sadd.s32 1, %s2505_s14  }
  0x4a   : >> { %p550_p4 = scmp.ge.s32.totalorder %s553_s14, 2  }
  0x4b   : >> { %v567_v7 = vsub.f32 1.0, %v566_v6 }
  0x4d   : >> { %563 = vadd.xlane.f32.xlu0 %v562_v3  ;;  %v568_v8 = vmul.f32 %v2249_v5, %v567_v7 }
  0x4f   : >> { %v569_v9 = vadd.f32 %v2249_v5, %v568_v8 }
  0x51   : >> { %v571_v10 = vsel %vm570_vm1, %v2249_v5, %v569_v9 }
  0xb8   : >> { %v561_v11 = vpop.xlane.xlu0 %560 }
  0xb9   : >> { %v572_v12 = vmul.f32 %v571_v10, %v561_v11 }
  0xbb   : >> { %v574_v13 = vsub.f32 %v556_v0, %v572_v12 }
  0xbd   : >> { %v576_v14 = vmul.f32 %v574_v13, %v574_v13 }
  0xbf   : >> { %v578_v15 = vsel %vm558_vm0, %v576_v14, 0.0 }
  0xc0   : >> { %579 = vadd.xlane.f32.xlu1 %v578_v15  ;;  %v564_v16 = vpop.xlane.xlu0 %563 }
  0xc1   : >> { %v573_v17 = vmul.f32 %v571_v10, %v564_v16 }
  0xc3   : >> { %v575_v18 = vsub.f32 %v557_v2, %v573_v17 }
  0xc5   : >> { %v577_v19 = vmul.f32 %v575_v18, %v575_v18 }
  0xc7   : >> { %v581_v20 = vsel %vm558_vm0, %v577_v19, 0.0 }
  0xc8   : >> { %582 = vadd.xlane.f32.xlu1 %v581_v20 }
 0x133   : >> { %v580_v22 = vpop.xlane.xlu1 %579 }
 0x134   : >> { %v584_v24 = vmul.f32 %v580_v22, %v571_v10 }
 0x136   : >> { %v586_v25 = vadd.f32 1e-05, %v584_v24 }
 0x138   : >> { %2250 = vrsqrt.f32 %v586_v25  ;;  %vm594_vm3 = vweird.f32 %v586_v25 }
 0x13b   : >> { %v583_v26 = vpop.xlane.xlu1 %582 }
 0x13c   : >> { %v585_v27 = vmul.f32 %v583_v26, %v571_v10 }
 0x13e   : >> { %v2251_v28 = vpop.eup %2250  ;;  %v587_v29 = vadd.f32 1e-05, %v585_v27 }
 0x13f   : >> { %v589_v30 = vmul.f32 %v2251_v28, %v586_v25  ;;  %vm595_vm2 = vweird.f32 %v2251_v28 }
 0x140   : >> { %2252 = vrsqrt.f32 %v587_v29  ;;  %vm596_vm4 = vmor %vm594_vm3, %vm595_vm2  ;;  %vm604_vm6 = vweird.f32 %v587_v29 }
 0x141   : >> { %v590_v31 = vmul.f32 %v2251_v28, %v589_v30 }
 0x143   : >> { %v591_v32 = vmul.f32 0.5, %v590_v31 }
 0x145   : >> { %v592_v33 = vsub.f32 1.5, %v591_v32 }
 0x146   : >> { %v2253_v34 = vpop.eup %2252 }
 0x147   : >> { %v593_v35 = vmul.f32 %v2251_v28, %v592_v33  ;;  %v599_v36 = vmul.f32 %v2253_v34, %v587_v29  ;;  %vm605_vm5 = vweird.f32 %v2253_v34 }
 0x148   : >> { %vm606_vm7 = vmor %vm604_vm6, %vm605_vm5 }
 0x149   : >> { %v600_v37 = vmul.f32 %v2253_v34, %v599_v36  ;;  %v597_v38 = vsel %vm596_vm4, %v2251_v28, %v593_v35 }
 0x14a   : >> { %v608_v41 = vmul.f32 %v597_v38, %v574_v13 }
 0x14b   : >> { %v601_v39 = vmul.f32 0.5, %v600_v37 }
 0x14c   : >> { %v614_v46 = vmul.f32 %v2245_v42, %v608_v41 }
 0x14d   : >> { %v602_v40 = vsub.f32 1.5, %v601_v39 }
 0x14e   : >> { %v620_v49 = vadd.f32 %v2246_v47, %v614_v46 }
 0x14f   : >> { %v603_v43 = vmul.f32 %v2253_v34, %v602_v40 }
 0x151   : >> { %v607_v44 = vsel %vm606_vm7, %v2253_v34, %v603_v43 }
 0x152   : >> { %v609_v45 = vmul.f32 %v607_v44, %v575_v18 }
 0x154   : >> { %v615_v48 = vmul.f32 %v2245_v42, %v609_v45 }
 0x156   : >> { %v621_v50 = vadd.f32 %v2246_v47, %v615_v48 }
 0x158   : >> { %v622_v51 = vpack.c.bf16 %v621_v50, %v620_v49 }
 0x15a   : >> { %1875 = vmatmul.msk.bf16.vlgmr.msra.gmra.mxu0 %vm558_vm0, %v622_v51 }
 0x1d7   : >> { %v655_v53 = vpop.f32.mrf.mxu0 }
 0x1d8   : >> { %v656_v54 = vadd.f32 %v2247_v52, %v655_v53 }
 0x1da   : >> { %v660_v55 = vmul.f32 0.35355338, %v656_v54  ;;  %v671_v56 = vpack.c.bf16 %v656_v54, %v656_v54 }
 0x1dc   : >> { %v662_v57 = vpack.c.bf16 %v660_v55, %v660_v55  ;;  %739 = vrot.lane.b32.xlu1 %v671_v56, %s2513_s26  ;;  %685 = vrot.lane.b32.xlu0 %v671_v56, %s2514_s29 }
 0x1dd   : >> { %675 = vrot.lane.b32.xlu2 %v671_v56, %s3104_s22  ;;  %s2523_s22 = smov 40  }
 0x1de   : >> { %669 = vst.msk [vmem:[%s2773_s25] sm:$0xf] %vm668_vm8, %v662_v57 }
 0x1df   : >> { %v657_v58 = vpop.f32.mrf.mxu0 }
 0x1e0   : >> { %v658_v59 = vadd.f32 %v2247_v52, %v657_v58 }
 0x1e2   : >> { %v661_v60 = vmul.f32 0.35355338, %v658_v59  ;;  %v672_v62 = vpack.c.bf16 %v658_v59, %v658_v59 }
 0x1e4   : >> { %v663_v61 = vpack.c.bf16 %v661_v60, %v661_v60  ;;  %770 = vrot.lane.b32.xlu1 %v671_v56, %s2516_s21  ;;  %728 = vrot.lane.b32.xlu0 %v662_v57, %s2517_s13 }
 0x1e5   : >> { %708 = vrot.lane.b32.xlu2 %v671_v56, %s2518_s12 }
 0x1e6   : >> { %670 = vst.msk [vmem:[%s2773_s25 + $0x4] sm:$0xf] %vm668_vm8, %v663_v61 }
 0x1ec   : >> { %687 = vrot.lane.b32.xlu1 %v672_v62, %s2514_s29  ;;  %759 = vrot.lane.b32.xlu0 %v662_v57, %s2519_s15  ;;  %s2782_s29 = scalar_lea.vmem [#allocation3], %s2768_s24 }
 0x1ed   : >> { %718 = vrot.lane.b32.xlu2 %v671_v56, %s2520_s19 }
 0x1f4   : >> { %720 = vrot.lane.b32.xlu1 %v672_v62, %s2520_s19  ;;  %710 = vrot.lane.b32.xlu0 %v672_v62, %s2518_s12 }
 0x1f5   : >> { %749 = vrot.lane.b32.xlu2 %v671_v56, %s2521_s20 }
 0x1fc   : >> { %751 = vrot.lane.b32.xlu1 %v672_v62, %s2521_s20  ;;  %741 = vrot.lane.b32.xlu0 %v672_v62, %s2513_s26 }
 0x1fd   : >> { %697 = vrot.lane.b32.xlu2 %v662_v57, %s2522_s23 }
 0x204   : >> { %782 = vrot.lane.b32.xlu1 %v672_v62, %s2523_s22  ;;  %772 = vrot.lane.b32.xlu0 %v672_v62, %s2516_s21 }
 0x205   : >> { %677 = vrot.lane.b32.xlu2 %v672_v62, %s3127_s0  ;;  %s2789_s0 = scalar_lea.vmem [#allocation4], %s2768_s24 }
 0x20d   : >> { %699 = vrot.lane.b32.xlu2 %v663_v61, %s2522_s23 }
 0x215   : >> { %730 = vrot.lane.b32.xlu2 %v663_v61, %s2517_s13 }
 0x21d   : >> { %761 = vrot.lane.b32.xlu2 %v663_v61, %s2519_s15 }
 0x225   : >> { %780 = vrot.lane.b32.xlu2 %v671_v56, %s2523_s22 }
 0x237   : >> { %v676_v63 = vpop.permute.xlu2 %675 }
 0x238   : >> { %683 = vst.msk [vmem:[%s2782_s29] sm:$0xf] %vm668_vm8, %v676_v63 }
 0x23f   : >> { %v709_v0 = vpop.permute.xlu2 %708 }
 0x240   : >> { %1883 = vst.msk [vmem:[%s2782_s29 + $0x10] sm:$0xf] %vm668_vm8, %v709_v0 }
 0x247   : >> { %v719_v1 = vpop.permute.xlu2 %718 }
 0x248   : >> { %1886 = vst.msk [vmem:[%s2789_s0 + $0x10] sm:$0xf] %vm668_vm8, %v719_v1 }
 0x24e   : >> { %v740_v2 = vpop.permute.xlu1 %739  ;;  %v686_v3 = vpop.permute.xlu0 %685 }
 0x24f   : >> { %1892 = vst.msk [vmem:[%s2782_s29 + $0x20] sm:$0xf] %vm668_vm8, %v740_v2  ;;  %v750_v4 = vpop.permute.xlu2 %749 }
 0x250   : >> { %693 = vst.msk [vmem:[%s2789_s0] sm:$0xf] %vm668_vm8, %v686_v3 }
 0x251   : >> { %1895 = vst.msk [vmem:[%s2789_s0 + $0x20] sm:$0xf] %vm668_vm8, %v750_v4 }
 0x256   : >> { %v771_v5 = vpop.permute.xlu1 %770  ;;  %v729_v6 = vpop.permute.xlu0 %728 }
 0x257   : >> { %1901 = vst.msk [vmem:[%s2782_s29 + $0x30] sm:$0xf] %vm668_vm8, %v771_v5  ;;  %v698_v7 = vpop.permute.xlu2 %697 }
 0x258   : >> { %1889 = vst.msk [vmem:[%s2773_s25 + $0x20] sm:$0xf] %vm668_vm8, %v729_v6 }
 0x259   : >> { %1880 = vst.msk [vmem:[%s2773_s25 + $0x10] sm:$0xf] %vm668_vm8, %v698_v7 }
 0x25e   : >> { %v688_v8 = vpop.permute.xlu1 %687  ;;  %v760_v9 = vpop.permute.xlu0 %759 }
 0x25f   : >> { %694 = vst.msk [vmem:[%s2789_s0 + $0x4] sm:$0xf] %vm668_vm8, %v688_v8  ;;  %v678_v10 = vpop.permute.xlu2 %677 }
 0x260   : >> { %1898 = vst.msk [vmem:[%s2773_s25 + $0x30] sm:$0xf] %vm668_vm8, %v760_v9 }
 0x261   : >> { %684 = vst.msk [vmem:[%s2782_s29 + $0x4] sm:$0xf] %vm668_vm8, %v678_v10 }
 0x266   : >> { %v721_v11 = vpop.permute.xlu1 %720  ;;  %v711_v12 = vpop.permute.xlu0 %710 }
 0x267   : >> { %1887 = vst.msk [vmem:[%s2789_s0 + $0x14] sm:$0xf] %vm668_vm8, %v721_v11  ;;  %v700_v13 = vpop.permute.xlu2 %699 }
 0x268   : >> { %1884 = vst.msk [vmem:[%s2782_s29 + $0x14] sm:$0xf] %vm668_vm8, %v711_v12 }
 0x269   : >> { %1881 = vst.msk [vmem:[%s2773_s25 + $0x14] sm:$0xf] %vm668_vm8, %v700_v13 }
 0x26e   : >> { %v752_v14 = vpop.permute.xlu1 %751  ;;  %v742_v15 = vpop.permute.xlu0 %741 }
 0x26f   : >> { %1896 = vst.msk [vmem:[%s2789_s0 + $0x24] sm:$0xf] %vm668_vm8, %v752_v14  ;;  %v731_v16 = vpop.permute.xlu2 %730 }
 0x270   : >> { %1893 = vst.msk [vmem:[%s2782_s29 + $0x24] sm:$0xf] %vm668_vm8, %v742_v15 }
 0x271   : >> { %1890 = vst.msk [vmem:[%s2773_s25 + $0x24] sm:$0xf] %vm668_vm8, %v731_v16 }
 0x276   : >> { %v783_v17 = vpop.permute.xlu1 %782  ;;  %v773_v18 = vpop.permute.xlu0 %772 }
 0x277   : >> { %1905 = vst.msk [vmem:[%s2789_s0 + $0x34] sm:$0xf] %vm668_vm8, %v783_v17  ;;  %v762_v19 = vpop.permute.xlu2 %761 }
 0x278   : >> { %1902 = vst.msk [vmem:[%s2782_s29 + $0x34] sm:$0xf] %vm668_vm8, %v773_v18 }
 0x279   : >> { %1899 = vst.msk [vmem:[%s2773_s25 + $0x34] sm:$0xf] %vm668_vm8, %v762_v19 }
 0x27c   : > { %552 = sbr.rel (!%p550_p4) target bundleno = 65 (0x41), region = 168 }
 0x27f   : >> { %v781_v20 = vpop.permute.xlu2 %780 }
 0x280   : >> { %1904 = vst.msk [vmem:[%s2789_s0 + $0x30] sm:$0xf] %vm668_vm8, %v781_v20 }
 0x281 PF: > { %v2072_v21 = vld [vmem:[#allocation3 + $0x18] sm:$0xff]  ;;  %vm853_vm9 = vcmask 64512   ;;  %v2074_v22 = vld [vmem:[#allocation3 + $0x28] sm:$0xff]  ;;  %s1906_s24 = sshll.u32 %s2485_s16, 4  ;;  %v2071_v27 = vld [vmem:[#allocation3 + $0x10] sm:$0xff]  ;;  %vm991_vm10 = vcmask 261120  }
 0x282   : > { %v2070_v23 = vld [vmem:[#allocation3 + $0x8] sm:$0xff]  ;;  %v899_v24 = vsel %vm853_vm9, %v2072_v21, 0  ;;  %v937_v25 = vsel %vm853_vm9, %v2074_v22, 0  ;;  %v2073_v28 = vld [vmem:[#allocation3 + $0x20] sm:$0xff]  ;;  %v2076_v29 = vld [vmem:[#allocation3 + $0x38] sm:$0xff]  ;;  %s794_s14 = sshra.s32 %s1906_s24, 3  ;;  %s791_s12 = scalar_lea.vmem %s2733_s27, %s1906_s24 }
 0x283   : > { %907 = vmatpush.bf16.xpose.msra.mxu1 %v899_v24  ;;  %945 = vmatpush.bf16.xpose.msra.mxu3 %v937_v25  ;;  %v861_v26 = vsel %vm853_vm9, %v2070_v23, 0  ;;  %v2069_v30 = vld [vmem:[#allocation3] sm:$0xff]  ;;  %v896_v31 = vsel %vm853_vm9, %v2071_v27, 0  ;;  %v934_v32 = vsel %vm853_vm9, %v2073_v28, 0  ;;  %s1907_s26 = sshll.u32 %s794_s14, 2  ;;  %v975_v33 = vsel %vm853_vm9, %v2076_v29, 0 }
 0x284   : > { %869 = vmatpush.bf16.xpose.msra.mxu0 %v861_v26  ;;  %v858_v34 = vsel %vm853_vm9, %v2069_v30, 0  ;;  %v2075_v35 = vld [vmem:[#allocation3 + $0x30] sm:$0xff]  ;;  %s797_s22 = scalar_lea.vmem [#allocation2], %s1907_s26  ;;  %s2524_s25 = smov 16   ;;  %vm1234_vm11 = vcmask 60416   ;;  %vm1247_vm12 = vcmask 126016  }
 0x285   : > { %v2066_v36 = vld [vmem:[%s797_s22 + $0x10] sm:$0xff]  ;;  %v2067_v37 = vld [vmem:[%s797_s22 + $0x20] sm:$0xff]  ;;  %v972_v39 = vsel %vm853_vm9, %v2075_v35, 0  ;;  %s2525_s21 = smov 8   ;;  %s2526_s13 = smov 24   ;;  %vm1260_vm13 = vcmask 191616  }
 0x286   : > { %v2065_v38 = vld [vmem:[%s797_s22] sm:$0xff]  ;;  %v2068_v40 = vld [vmem:[%s797_s22 + $0x30] sm:$0xff]  ;;  %vm1273_vm14 = vcmask 257216   ;;  %s2054_s22 = sshll.u32 %s2485_s16, 1  ;;  %s3128_s15 = sld [smem:[#allocation33_spill]] }
 0x287   : > { %v2084_v35 = vld [vmem:[#allocation4 + $0x38] sm:$0xff]  ;;  %s3130_s0 = sld [smem:[#allocation34_spill]]  ;;  %s1618_s14 = sshll.u32 %s2735_s28, 4  ;;  %s1619_s14 = int_to_ptr.vmem [resolvable:$true] %s1618_s14 }
 0x28b   : > { %908 = vmatpush.bf16.xpose.msra.mxu1 %v896_v31  ;;  %946 = vmatpush.bf16.xpose.msra.mxu3 %v934_v32 }
 0x28c   : > { %870 = vmatpush.bf16.xpose.msra.mxu0 %v858_v34  ;;  %v2081_v34 = vld [vmem:[#allocation4 + $0x20] sm:$0xff] }
 0x292   : > { %1933 = vmatmul.msk.bf16.vlgmr.msra.gmra.mxu1 %vm853_vm9, %v2066_v36  ;;  %1946 = vmatmul.msk.bf16.vlgmr.msra.gmra.mxu3 %vm853_vm9, %v2067_v37  ;;  %v2080_v37 = vld [vmem:[#allocation4 + $0x18] sm:$0xff] }
 0x293   : > { %983 = vmatpush.bf16.xpose.msrb.mxu3 %v975_v33  ;;  %1920 = vmatmul.msk.bf16.vlgmr.msra.gmra.mxu0 %vm853_vm9, %v2065_v38  ;;  %v2082_v33 = vld [vmem:[#allocation4 + $0x28] sm:$0xff]  ;;  %v2083_v38 = vld [vmem:[#allocation4 + $0x30] sm:$0xff] }
 0x294   : > { %1190 = vmatpush.bf16.msra.mxu2 %v2082_v33  ;;  %1156 = vmatpush.bf16.msrb.mxu1 %v2080_v37  ;;  %v2087_v37 = vld [vmem:[#allocation9 + $0x8] sm:$0xff] }
 0x298   : > { %1191 = vmatpush.bf16.msra.mxu2 %v2081_v34 }
 0x29b   : > { %984 = vmatpush.bf16.xpose.msrb.mxu3 %v972_v39  ;;  %v2079_v39 = vld [vmem:[#allocation4 + $0x10] sm:$0xff] }
 0x29c   : > { %1157 = vmatpush.bf16.msrb.mxu1 %v2079_v39 }
 0x2a2   : > { %1959 = vmatmul.msk.bf16.vlgmr.msrb.gmra.mxu3 %vm853_vm9, %v2068_v40 }
 0x2a3   : > { %1224 = vmatpush.bf16.msra.mxu3 %v2084_v35 }
 0x2a7   : > { %1225 = vmatpush.bf16.msra.mxu3 %v2083_v38  ;;  %v2086_v38 = vld [vmem:[#allocation9] sm:$0xff] }
 0x30f   : > { %v910_v41 = vpop.f32.mrf.mxu1 }
 0x310   : > { %994 = vst.msk [vmem:[%s2737_s18 + $0x10] sm:$0xff] %vm991_vm10, %v910_v41  ;;  %v1006_v42 = vsel %vm991_vm10, %v910_v41, -inf  ;;  %v2852_v43 = vpop.f32.mrf.mxu0 }
 0x311   : > { %1007 = vmax.xlane.f32.xlu2 %v1006_v42  ;;  %992 = vst.msk [vmem:[%s2737_s18] sm:$0xff] %vm991_vm10, %v2852_v43  ;;  %v1000_v51 = vsel %vm991_vm10, %v2852_v43, -inf }
 0x315   : > { %v948_v44 = vpop.f32.mrf.mxu3 }
 0x316   : > { %996 = vst.msk [vmem:[%s2737_s18 + $0x20] sm:$0xff] %vm991_vm10, %v948_v44  ;;  %v1012_v45 = vsel %vm991_vm10, %v948_v44, -inf }
 0x317   : > { %1013 = vmax.xlane.f32.xlu0 %v1012_v45  ;;  %v912_v46 = vpop.f32.mrf.mxu1 }
 0x318   : > { %995 = vst.msk [vmem:[%s2737_s18 + $0x18] sm:$0xff] %vm991_vm10, %v912_v46  ;;  %v1009_v47 = vsel %vm991_vm10, %v912_v46, -inf  ;;  %v2863_v48 = vpop.f32.mrf.mxu0 }
 0x319   : > { %1010 = vmax.xlane.f32.xlu2 %v1009_v47  ;;  %993 = vst.msk [vmem:[%s2737_s18 + $0x8] sm:$0xff] %vm991_vm10, %v2863_v48  ;;  %v1003_v56 = vsel %vm991_vm10, %v2863_v48, -inf }
 0x31d   : > { %v950_v49 = vpop.f32.mrf.mxu3 }
 0x31e   : > { %997 = vst.msk [vmem:[%s2737_s18 + $0x28] sm:$0xff] %vm991_vm10, %v950_v49  ;;  %v1015_v50 = vsel %vm991_vm10, %v950_v49, -inf }
 0x31f   : > { %1016 = vmax.xlane.f32.xlu0 %v1015_v50 }
 0x325   : > { %v986_v52 = vpop.f32.mrf.mxu3 }
 0x326   : > { %998 = vst.msk [vmem:[%s2737_s18 + $0x30] sm:$0xff] %vm991_vm10, %v986_v52  ;;  %v1018_v53 = vsel %vm991_vm10, %v986_v52, -inf }
 0x327   : > { %1019 = vmax.xlane.f32.xlu1 %v1018_v53  ;;  %1001 = vmax.xlane.f32.xlu0 %v1000_v51 }
 0x32d   : > { %v988_v54 = vpop.f32.mrf.mxu3 }
 0x32e   : > { %999 = vst.msk [vmem:[%s2737_s18 + $0x38] sm:$0xff] %vm991_vm10, %v988_v54  ;;  %v1021_v55 = vsel %vm991_vm10, %v988_v54, -inf }
 0x32f   : > { %1022 = vmax.xlane.f32.xlu1 %v1021_v55 }
 0x337   : > { %1004 = vmax.xlane.f32.xlu1 %v1003_v56 }
 0x384   : > { %v1008_v60 = vpop.xlane.xlu2 %1007 }
 0x385   : > { %v1026_v0 = vsub.f32 %v910_v41, %v1008_v60  ;;  %v2078_v41 = vld [vmem:[#allocation4 + $0x8] sm:$0xff] }
 0x386   : > { %1122 = vmatpush.bf16.msrb.mxu0 %v2078_v41 }
 0x387   : > { %v1036_v3 = vmul.f32 1.442695, %v1026_v0 }
 0x38a   : > { %v1014_v57 = vpop.xlane.xlu0 %1013 }
 0x38b   : > { %v1028_v58 = vsub.f32 %v948_v44, %v1014_v57  ;;  %v2077_v44 = vld [vmem:[#allocation4] sm:$0xff] }
 0x38c   : > { %v1011_v4 = vpop.xlane.xlu2 %1010  ;;  %1123 = vmatpush.bf16.msrb.mxu0 %v2077_v44 }
 0x38d   : > { %v1040_v59 = vmul.f32 1.442695, %v1028_v58  ;;  %v1027_v8 = vsub.f32 %v912_v46, %v1011_v4 }
 0x38f   : > { %2259 = vpow2.f32 %v1040_v59  ;;  %v1038_v11 = vmul.f32 1.442695, %v1027_v8 }
 0x390   : > { %1312 = vmatpush.bf16.msra.mxu0 %v2087_v37 }
 0x392   : > { %v1017_v61 = vpop.xlane.xlu0 %1016 }
 0x393   : > { %v1029_v62 = vsub.f32 %v950_v49, %v1017_v61 }
 0x394   : > { %1313 = vmatpush.bf16.msra.mxu0 %v2086_v38 }
 0x395   : > { %v2881_v63 = vpop.eup %2259  ;;  %v1042_v1 = vmul.f32 1.442695, %v1029_v62 }
 0x396   : > { %v1060_v2 = vsel %vm991_vm10, %v2881_v63, 0.0 }
 0x397   : > { %2261 = vpow2.f32 %v1042_v1  ;;  %1061 = vadd.xlane.f32.xlu2 %v1060_v2 }
 0x398   : > { %2263 = vpow2.f32 %v1036_v3 }
 0x39a   : > { %v1020_v5 = vpop.xlane.xlu1 %1019  ;;  %v1002_v12 = vpop.xlane.xlu0 %1001 }
 0x39b   : > { %v1030_v6 = vsub.f32 %v986_v52, %v1020_v5  ;;  %v1024_v17 = vsub.f32 %v2852_v43, %v1002_v12 }
 0x39d   : > { %v2885_v7 = vpop.eup %2261  ;;  %v1044_v9 = vmul.f32 1.442695, %v1030_v6  ;;  %v1032_v21 = vmul.f32 1.442695, %v1024_v17 }
 0x39e   : > { %v1063_v10 = vsel %vm991_vm10, %v2885_v7, 0.0  ;;  %v2889_v14 = vpop.eup %2263 }
 0x39f   : > { %2265 = vpow2.f32 %v1044_v9  ;;  %1064 = vadd.xlane.f32.xlu0 %v1063_v10  ;;  %v1054_v19 = vsel %vm991_vm10, %v2889_v14, 0.0 }
 0x3a0   : > { %2267 = vpow2.f32 %v1038_v11 }
 0x3a2   : > { %v1023_v13 = vpop.xlane.xlu1 %1022 }
 0x3a3   : > { %v1031_v15 = vsub.f32 %v988_v54, %v1023_v13 }
 0x3a5   : > { %v2891_v16 = vpop.eup %2265  ;;  %v1046_v18 = vmul.f32 1.442695, %v1031_v15 }
 0x3a6   : > { %v1066_v20 = vsel %vm991_vm10, %v2891_v16, 0.0  ;;  %v2898_v23 = vpop.eup %2267 }
 0x3a7   : > { %2269 = vpow2.f32 %v1046_v18  ;;  %1055 = vadd.xlane.f32.xlu0 %v1054_v19  ;;  %1067 = vadd.xlane.f32.xlu1 %v1066_v20  ;;  %v1057_v28 = vsel %vm991_vm10, %v2898_v23, 0.0 }
 0x3a8   : > { %2271 = vpow2.f32 %v1032_v21 }
 0x3aa   : > { %v1005_v22 = vpop.xlane.xlu1 %1004 }
 0x3ab   : > { %v1025_v24 = vsub.f32 %v2863_v48, %v1005_v22 }
 0x3ad   : > { %v2270_v25 = vpop.eup %2269  ;;  %v1034_v26 = vmul.f32 1.442695, %v1025_v24 }
 0x3ae   : > { %v1069_v27 = vsel %vm991_vm10, %v2270_v25, 0.0  ;;  %v2904_v29 = vpop.eup %2271 }
 0x3af   : > { %2273 = vpow2.f32 %v1034_v26  ;;  %1070 = vadd.xlane.f32.xlu2 %v1069_v27  ;;  %1058 = vadd.xlane.f32.xlu1 %v1057_v28  ;;  %v1048_v31 = vsel %vm991_vm10, %v2904_v29, 0.0 }
 0x3b5   : > { %v2906_v30 = vpop.eup %2273 }
 0x3b6   : > { %v1051_v32 = vsel %vm991_vm10, %v2906_v30, 0.0 }
 0x3b7   : > { %1049 = vadd.xlane.f32.xlu2 %v1048_v31  ;;  %1052 = vadd.xlane.f32.xlu0 %v1051_v32 }
 0x40a   : > { %v1062_v36 = vpop.xlane.xlu2 %1061 }
 0x40b   : > { %2275 = vrcp.f32 %v1062_v36 }
 0x411   : > { %v2276_v42 = vpop.eup %2275 }
 0x412   : > { %v1065_v40 = vpop.xlane.xlu0 %1064  ;;  %v1084_v43 = vmul.f32 %v2276_v42, %v2881_v63 }
 0x413   : > { %2277 = vrcp.f32 %v1065_v40 }
 0x414   : > { %v1092_v48 = vpack.c.bf16 %v1084_v43, %v1084_v43 }
 0x416   : > { %v1166_v51 = vunpack.c.l.b16 %v1092_v48 }
 0x419   : > { %v2278_v45 = vpop.eup %2277 }
 0x41a   : > { %v1068_v46 = vpop.xlane.xlu1 %1067  ;;  %v1085_v47 = vmul.f32 %v2278_v45, %v2885_v7  ;;  %v1056_v49 = vpop.xlane.xlu0 %1055 }
 0x41b   : > { %2279 = vrcp.f32 %v1068_v46  ;;  %v2254_v46 = vld [vmem:[%s3083_s6] ss:$0 sm:$0xff] }
 0x41c   : > { %v1093_v50 = vpack.c.bf16 %v1085_v47, %v1085_v47  ;;  %2281 = vrcp.f32 %v1056_v49  ;;  %v792_v47 = vld [vmem:[%s791_s12] sm:$0xff] }
 0x41e   : > { %v1167_v52 = vunpack.c.l.b16 %v1093_v50 }
 0x420   : > { %v1168_v53 = vpack.c.b16 %v1167_v52, %v1166_v51  ;;  %v793_v52 = vld [vmem:[%s791_s12 + $0x8] sm:$0xff] }
 0x421   : > { %v2280_v56 = vpop.eup %2279 }
 0x422   : > { %v1071_v54 = vpop.xlane.xlu2 %1070  ;;  %1986 = vmatmul.msk.bf16.vlgmr.msra.gmra.mxu2 %vm991_vm10, %v1168_v53  ;;  %v1059_v55 = vpop.xlane.xlu1 %1058  ;;  %v1086_v58 = vmul.f32 %v2280_v56, %v2891_v16 }
 0x423   : > { %2283 = vrcp.f32 %v1071_v54  ;;  %v2282_v57 = vpop.eup %2281 }
 0x424   : > { %2285 = vrcp.f32 %v1059_v55  ;;  %v1082_v59 = vmul.f32 %v2282_v57, %v2889_v14  ;;  %v1094_v62 = vpack.c.bf16 %v1086_v58, %v1086_v58  ;;  %v2527_v57 = vmov 32.0  }
 0x426   : > { %v1090_v2 = vpack.c.bf16 %v1082_v59, %v1082_v59  ;;  %v1200_v6 = vunpack.c.l.b16 %v1094_v62 }
 0x428   : > { %v1132_v8 = vunpack.c.l.b16 %v1090_v2 }
 0x429   : > { %v2284_v60 = vpop.eup %2283 }
 0x42a   : > { %v2286_v61 = vpop.eup %2285  ;;  %v1087_v63 = vmul.f32 %v2284_v60, %v2270_v25  ;;  %v1050_v0 = vpop.xlane.xlu2 %1049 }
 0x42b   : > { %v1053_v1 = vpop.xlane.xlu0 %1052  ;;  %v1083_v3 = vmul.f32 %v2286_v61, %v2898_v23  ;;  %2287 = vrcp.f32 %v1050_v0 }
 0x42c   : > { %v1095_v4 = vpack.c.bf16 %v1087_v63, %v1087_v63  ;;  %2289 = vrcp.f32 %v1053_v1 }
 0x42d   : > { %v1091_v5 = vpack.c.bf16 %v1083_v3, %v1083_v3  ;;  %2291 = vrcp.f32 %v2527_v57 }
 0x42e   : > { %v1201_v7 = vunpack.c.l.b16 %v1095_v4 }
 0x42f   : > { %v1133_v9 = vunpack.c.l.b16 %v1091_v5 }
 0x430   : > { %v1202_v10 = vpack.c.b16 %v1201_v7, %v1200_v6 }
 0x431   : > { %v2288_v11 = vpop.eup %2287  ;;  %v1134_v12 = vpack.c.b16 %v1133_v9, %v1132_v8 }
 0x432   : > { %v2290_v13 = vpop.eup %2289  ;;  %v1080_v14 = vmul.f32 %v2288_v11, %v2904_v29  ;;  %1995 = vmatmul.msk.bf16.vlgmr.msra.gmra.mxu3 %vm991_vm10, %v1202_v10  ;;  %v2089_v10 = vld [vmem:[#allocation11 + $0x8] sm:$0xff] }
 0x433   : > { %v1081_v15 = vmul.f32 %v2290_v13, %v2906_v30  ;;  %1977 = vmatmul.msk.bf16.vlgmr.msrb.gmra.mxu1 %vm991_vm10, %v1134_v12  ;;  %v2292_v58 = vpop.eup %2291 }
 0x434   : > { %v1088_v16 = vpack.c.bf16 %v1080_v14, %v1080_v14  ;;  %v1329_v59 = vmul.f32 32.0, %v2292_v58  ;;  %vm1333_vm15 = vweird.f32 %v2292_v58  ;;  %1415 = vmatpush.bf16.msra.mxu1 %v2089_v10  ;;  %v2088_v14 = vld [vmem:[#allocation11] sm:$0xff]  ;;  %v2092_v10 = vld [vmem:[%s3088_s11 + $0x10] sm:$0xff] }
 0x435   : > { %v1089_v17 = vpack.c.bf16 %v1081_v15, %v1081_v15 }
 0x436   : > { %v1098_v18 = vunpack.c.l.b16 %v1088_v16  ;;  %v1330_v60 = vsub.f32 1.0, %v1329_v59 }
 0x437   : > { %v1099_v19 = vunpack.c.l.b16 %v1089_v17 }
 0x438   : > { %v1331_v61 = vmul.f32 %v2292_v58, %v1330_v60  ;;  %1416 = vmatpush.bf16.msra.mxu1 %v2088_v14  ;;  %v2094_v60 = vld [vmem:[%s3088_s11 + $0x20] sm:$0xff] }
 0x439   : > { %v1100_v20 = vpack.c.b16 %v1099_v19, %v1098_v18 }
 0x43a   : > { %v1332_v62 = vadd.f32 %v2292_v58, %v1331_v61 }
 0x43b   : > { %1968 = vmatmul.msk.bf16.vlgmr.msrb.gmra.mxu0 %vm991_vm10, %v1100_v20 }
 0x43c   : > { %v1334_v63 = vsel %vm1333_vm15, %v2292_v58, %v1332_v62 }
 0x4a5   : > { %v1193_v21 = vpop.f32.mrf.mxu2 }
 0x4a6   : > { %v1250_v22 = vpack.c.bf16 %v1193_v21, %v1193_v21 }
 0x4a8   : > { %1254 = vrot.lane.b32.xlu0 %v1250_v22, %s2524_s25 }
 0x4ad   : > { %v1195_v32 = vpop.f32.mrf.mxu2 }
 0x4ae   : > { %v1251_v35 = vpack.c.bf16 %v1195_v32, %v1195_v32 }
 0x4b0   : > { %v1159_v23 = vpop.f32.mrf.mxu1 }
 0x4b1   : > { %v1237_v24 = vpack.c.bf16 %v1159_v23, %v1159_v23 }
 0x4b3   : > { %1241 = vrot.lane.b32.xlu1 %v1237_v24, %s2525_s21 }
 0x4b5   : > { %v1227_v25 = vpop.f32.mrf.mxu3 }
 0x4b6   : > { %v1263_v28 = vpack.c.bf16 %v1227_v25, %v1227_v25 }
 0x4b8   : > { %v1125_v26 = vpop.f32.mrf.mxu0  ;;  %v1161_v27 = vpop.f32.mrf.mxu1 }
 0x4b9   : > { %v1232_v29 = vpack.c.bf16 %v1125_v26, %v1125_v26  ;;  %v1238_v30 = vpack.c.bf16 %v1161_v27, %v1161_v27 }
 0x4bb   : > { %1235 = vst.msk [vmem:[#allocation5] sm:$0xf] %vm1234_vm11, %v1232_v29  ;;  %1267 = vrot.lane.b32.xlu1 %v1263_v28, %s2526_s13  ;;  %1243 = vrot.lane.b32.xlu2 %v1238_v30, %s2525_s21  ;;  %v2255_v30 = vld [vmem:[%s3084_s7] ss:$0 sm:$0xff] }
 0x4bd   : > { %v1229_v31 = vpop.f32.mrf.mxu3 }
 0x4be   : > { %v1264_v33 = vpack.c.bf16 %v1229_v31, %v1229_v31 }
 0x4c0   : > { %v1127_v34 = vpop.f32.mrf.mxu0  ;;  %1269 = vrot.lane.b32.xlu0 %v1264_v33, %s2526_s13 }
 0x4c1   : > { %v1233_v36 = vpack.c.bf16 %v1127_v34, %v1127_v34  ;;  %v2256_v34 = vld [vmem:[%s3085_s8] ss:$0 sm:$0xff] }
 0x4c3   : > { %1236 = vst.msk [vmem:[#allocation5 + $0x4] sm:$0xf] %vm1234_vm11, %v1233_v36  ;;  %1256 = vrot.lane.b32.xlu2 %v1251_v35, %s2524_s25  ;;  %s2055_s25 = sshll.u32 %s2489_s17, 2 }
 0x4c4   : > { %s1615_s19 = sadd.s32 %s2055_s25, %s2054_s22  ;;  %s1599_s25 = scalar_lea.sflag [#allocation8], %s2724_s5 }
 0x4c5   : > { %s2056_s27 = sshll.u32 %s1615_s19, 3 }
 0x4c6   : > { %s1617_s24 = scalar_lea.hbm %s3130_s0, %s2056_s27  ;;  %s2411_s27 = scalar_lea.hbm %s3130_s0, 64 }
 0x4c7   : > { %s1620_s26 = sshll.u32 %s1617_s24, 4  ;;  %s1621_s26 = int_to_ptr.hbm [resolvable:$true] %s1620_s26 }
 0x4c8   : > { %s2405_s13 = sshra.s32 %s1621_s26, 4  ;;  %s2406_s13 = int_to_ptr.hbm [resolvable:$true] %s2405_s13 }
 0x4c9   : > { %s2407_s12 = scalar_lea.hbm %s2406_s13, 16  ;;  %p2412_p9 = scmp.lt.s32.totalorder %s2406_s13, %s3130_s0 }
 0x4ca   : > { %p2408_p5 = scmp.ne.s32.totalorder %s2406_s13, %s2407_s12  ;;  %p2413_p10 = scmp.lt.s32.totalorder %s2411_s27, %s2407_s12 }
 0x4cc   : > { %p2409_p6 = pnand %p2408_p5, %p2663_p3  ;;  %p2414_p11 = por %p2413_p10, %p2412_p9 }
 0x4ce   : > { %p2410_p7 = pneg %p2409_p6 }
 0x4d0   : > { %p2415_p12 = pnand %p2414_p11, %p2410_p7 }
 0x515   : > { %v1244_v39 = vpop.permute.xlu2 %1243 }
 0x516   : > { %1249 = vst.msk [vmem:[#allocation5 + $0x4] sm:$0xf] %vm1247_vm12, %v1244_v39 }
 0x51a   : > { %v1255_v42 = vpop.permute.xlu0 %1254 }
 0x51d   : > { %v1257_v40 = vpop.permute.xlu2 %1256 }
 0x51e   : > { %1262 = vst.msk [vmem:[#allocation5 + $0x4] sm:$0xf] %vm1260_vm13, %v1257_v40 }
 0x525   : > { %v1242_v41 = vpop.permute.xlu1 %1241 }
 0x526   : > { %1248 = vst.msk [vmem:[#allocation5] sm:$0xf] %vm1247_vm12, %v1242_v41  ;;  %v2257_v41 = vld [vmem:[%s3087_s10] ss:$0 sm:$0xff] }
 0x527   : > { %1261 = vst.msk [vmem:[#allocation5] sm:$0xf] %vm1260_vm13, %v1255_v42 }
 0x52d   : > { %v1268_v43 = vpop.permute.xlu1 %1267 }
 0x52e   : > { %1274 = vst.msk [vmem:[#allocation5] sm:$0xf] %vm1273_vm14, %v1268_v43 }
 0x532   : > { %v1270_v44 = vpop.permute.xlu0 %1269 }
 0x533   : > { %1275 = vst.msk [vmem:[#allocation5 + $0x4] sm:$0xf] %vm1273_vm14, %v1270_v44  ;;  %v2097_v44 = vld [vmem:[%s3088_s11 + $0x38] sm:$0xff] }
 0x534   : > { %1580 = vmatpush.bf16.msrb.mxu2 %v2097_v44 }
 0x53a   : > { %v2085_v45 = vld [vmem:[#allocation5] sm:$0xff] }
 0x53b   : > { %2008 = vmatmul.msk.bf16.vlgmr.msra.gmra.mxu0 %vm991_vm10, %v2085_v45 }
 0x5b8   : > { %v1315_v48 = vpop.f32.mrf.mxu0 }
 0x5b9   : > { %v1316_v49 = vadd.f32 %v2254_v46, %v1315_v48 }
 0x5bb   : > { %v2934_v50 = vadd.f32 %v1316_v49, %v792_v47  ;;  %v2096_v47 = vld [vmem:[%s3088_s11 + $0x30] sm:$0xff] }
 0x5bc   : > { %1581 = vmatpush.bf16.msrb.mxu2 %v2096_v47 }
 0x5bd   : > { %v1322_v51 = vsel %vm991_vm10, %v2934_v50, 0.0 }
 0x5be   : > { %1323 = vadd.xlane.f32.xlu2 %v1322_v51 }
 0x5c0   : > { %v1317_v53 = vpop.f32.mrf.mxu0 }
 0x5c1   : > { %v1318_v54 = vadd.f32 %v2254_v46, %v1317_v53 }
 0x5c3   : > { %v2938_v55 = vadd.f32 %v1318_v54, %v793_v52  ;;  %v2095_v54 = vld [vmem:[%s3088_s11 + $0x28] sm:$0xff] }
 0x5c4   : > { %1582 = vmatpush.bf16.msrb.mxu2 %v2095_v54 }
 0x5c5   : > { %v1325_v56 = vsel %vm991_vm10, %v2938_v55, 0.0 }
 0x5c6   : > { %1326 = vadd.xlane.f32.xlu1 %v1325_v56 }
 0x5c8   : > { %1583 = vmatpush.bf16.msrb.mxu2 %v2094_v60 }
 0x631   : > { %v1324_v0 = vpop.xlane.xlu2 %1323 }
 0x632   : > { %v1335_v1 = vmul.f32 %v1334_v63, %v1324_v0 }
 0x634   : > { %v1337_v2 = vsub.f32 %v2934_v50, %v1335_v1 }
 0x636   : > { %v1339_v3 = vmul.f32 %v1337_v2, %v1337_v2 }
 0x638   : > { %v1341_v4 = vsel %vm991_vm10, %v1339_v3, 0.0 }
 0x639   : > { %v1327_v5 = vpop.xlane.xlu1 %1326  ;;  %1342 = vadd.xlane.f32.xlu0 %v1341_v4 }
 0x63a   : > { %v1336_v6 = vmul.f32 %v1334_v63, %v1327_v5 }
 0x63c   : > { %v1338_v7 = vsub.f32 %v2938_v55, %v1336_v6 }
 0x63e   : > { %v1340_v8 = vmul.f32 %v1338_v7, %v1338_v7 }
 0x640   : > { %v1344_v9 = vsel %vm991_vm10, %v1340_v8, 0.0 }
 0x641   : > { %1345 = vadd.xlane.f32.xlu2 %v1344_v9 }
 0x6ac   : > { %v1343_v11 = vpop.xlane.xlu0 %1342 }
 0x6ad   : > { %v1347_v12 = vmul.f32 %v1343_v11, %v1334_v63 }
 0x6af   : > { %v1349_v13 = vadd.f32 1e-05, %v1347_v12 }
 0x6b1   : > { %2293 = vrsqrt.f32 %v1349_v13  ;;  %vm1357_vm1 = vweird.f32 %v1349_v13 }
 0x6b4   : > { %v1346_v15 = vpop.xlane.xlu2 %1345 }
 0x6b5   : > { %v1348_v16 = vmul.f32 %v1346_v15, %v1334_v63 }
 0x6b7   : > { %v2294_v17 = vpop.eup %2293  ;;  %v1350_v18 = vadd.f32 1e-05, %v1348_v16 }
 0x6b8   : > { %v1352_v19 = vmul.f32 %v2294_v17, %v1349_v13  ;;  %vm1358_vm0 = vweird.f32 %v2294_v17 }
 0x6b9   : > { %2295 = vrsqrt.f32 %v1350_v18  ;;  %vm1359_vm2 = vmor %vm1357_vm1, %vm1358_vm0  ;;  %vm1367_vm4 = vweird.f32 %v1350_v18 }
 0x6ba   : > { %v1353_v20 = vmul.f32 %v2294_v17, %v1352_v19 }
 0x6bc   : > { %v1354_v21 = vmul.f32 0.5, %v1353_v20 }
 0x6be   : > { %v1355_v22 = vsub.f32 1.5, %v1354_v21 }
 0x6bf   : > { %v2296_v23 = vpop.eup %2295 }
 0x6c0   : > { %v1356_v24 = vmul.f32 %v2294_v17, %v1355_v22  ;;  %v1362_v25 = vmul.f32 %v2296_v23, %v1350_v18  ;;  %vm1368_vm3 = vweird.f32 %v2296_v23  ;;  %v2091_v18 = vld [vmem:[%s3088_s11 + $0x8] sm:$0xff] }
 0x6c1   : > { %vm1369_vm5 = vmor %vm1367_vm4, %vm1368_vm3 }
 0x6c2   : > { %v1363_v26 = vmul.f32 %v2296_v23, %v1362_v25  ;;  %v1360_v27 = vsel %vm1359_vm2, %v2294_v17, %v1356_v24  ;;  %v2090_v24 = vld [vmem:[%s3088_s11] sm:$0xff] }
 0x6c3   : > { %v1371_v31 = vmul.f32 %v1360_v27, %v1337_v2  ;;  %v2093_v2 = vld [vmem:[%s3088_s11 + $0x18] sm:$0xff] }
 0x6c4   : > { %v1364_v28 = vmul.f32 0.5, %v1363_v26  ;;  %1584 = vmatpush.bf16.msrb.mxu2 %v2093_v2 }
 0x6c5   : > { %v1377_v35 = vmul.f32 %v2255_v30, %v1371_v31 }
 0x6c6   : > { %v1365_v29 = vsub.f32 1.5, %v1364_v28 }
 0x6c7   : > { %v1383_v38 = vadd.f32 %v2256_v34, %v1377_v35 }
 0x6c8   : > { %v1366_v32 = vmul.f32 %v2296_v23, %v1365_v29  ;;  %1585 = vmatpush.bf16.msrb.mxu2 %v2092_v10 }
 0x6ca   : > { %v1370_v33 = vsel %vm1369_vm5, %v2296_v23, %v1366_v32 }
 0x6cb   : > { %v1372_v36 = vmul.f32 %v1370_v33, %v1338_v7 }
 0x6cc   : > { %1586 = vmatpush.bf16.msrb.mxu2 %v2091_v18 }
 0x6cd   : > { %v1378_v37 = vmul.f32 %v2255_v30, %v1372_v36 }
 0x6cf   : > { %v1384_v39 = vadd.f32 %v2256_v34, %v1378_v37 }
 0x6d0   : > { %1587 = vmatpush.bf16.msrb.mxu2 %v2090_v24 }
 0x6d1   : > { %v1385_v40 = vpack.c.bf16 %v1384_v39, %v1383_v38 }
 0x6d3   : > { %2017 = vmatmul.msk.bf16.vlgmr.msra.gmra.mxu1 %vm991_vm10, %v1385_v40 }
 0x750   : > { %v1418_v42 = vpop.f32.mrf.mxu1 }
 0x751   : > { %v2956_v43 = vadd.f32 %v2257_v41, %v1418_v42 }
 0x753   : > { %v2962_v45 = vmul.f32 0.70710677, %v2956_v43 }
 0x755   : > { %v1427_v46 = vmul.f32 %v2962_v45, %v2962_v45 }
 0x757   : > { %v1428_v48 = vmin.f32 %v1427_v46, 16.0 }
 0x758   : > { %v1420_v49 = vpop.f32.mrf.mxu1 }
 0x759   : > { %v1429_v51 = vmul.f32 2.1237322e-06, %v1428_v48  ;;  %v1440_v52 = vmul.f32 3.8918573e-05, %v1428_v48  ;;  %v2969_v53 = vadd.f32 %v2257_v41, %v1420_v49 }
 0x75b   : > { %v1430_v56 = vadd.f32 0.00028619796, %v1429_v51  ;;  %v1441_v57 = vadd.f32 0.001143296, %v1440_v52  ;;  %v2975_v58 = vmul.f32 0.70710677, %v2969_v53 }
 0x75d   : > { %v1442_v59 = vmul.f32 %v1441_v57, %v1428_v48  ;;  %v1467_v61 = vmul.f32 %v2975_v58, %v2975_v58  ;;  %v1431_v62 = vmul.f32 %v1430_v56, %v1428_v48 }
 0x75f   : > { %v1443_v63 = vadd.f32 0.014752088, %v1442_v59  ;;  %v1468_v0 = vmin.f32 %v1467_v61, 16.0  ;;  %v1432_v5 = vadd.f32 0.0036580483, %v1431_v62 }
 0x761   : > { %v1444_v1 = vmul.f32 %v1443_v63, %v1428_v48  ;;  %v1469_v3 = vmul.f32 2.1237322e-06, %v1468_v0  ;;  %v1480_v4 = vmul.f32 3.8918573e-05, %v1468_v0  ;;  %v1433_v13 = vmul.f32 %v1432_v5, %v1428_v48 }
 0x763   : > { %v1445_v6 = vadd.f32 0.112945676, %v1444_v1  ;;  %v1470_v7 = vadd.f32 0.00028619796, %v1469_v3  ;;  %v1481_v8 = vadd.f32 0.001143296, %v1480_v4 }
 0x764   : > { %v1434_v20 = vadd.f32 0.05243302, %v1433_v13 }
 0x765   : > { %v1446_v9 = vmul.f32 %v1445_v6, %v1428_v48  ;;  %v1471_v11 = vmul.f32 %v1470_v7, %v1468_v0  ;;  %v1482_v12 = vmul.f32 %v1481_v8, %v1468_v0  ;;  %v1423_v6 = vmul.f32 0.5, %v2956_v43 }
 0x766   : > { %v1435_v26 = vmul.f32 %v1434_v20, %v1428_v48  ;;  %v1424_v7 = vmul.f32 0.5, %v2969_v53 }
 0x767   : > { %v1447_v14 = vadd.f32 0.4994258, %v1446_v9  ;;  %v1472_v15 = vadd.f32 0.0036580483, %v1471_v11  ;;  %v1483_v16 = vadd.f32 0.014752088, %v1482_v12 }
 0x768   : > { %v1436_v31 = vadd.f32 0.18741608, %v1435_v26 }
 0x769   : > { %v1448_v17 = vmul.f32 %v1447_v14, %v1428_v48  ;;  %v1484_v19 = vmul.f32 %v1483_v16, %v1468_v0  ;;  %v1473_v22 = vmul.f32 %v1472_v15, %v1468_v0 }
 0x76a   : > { %v1437_v36 = vmul.f32 %v1436_v31, %v1428_v48 }
 0x76b   : > { %v1449_v21 = vadd.f32 1.0, %v1448_v17  ;;  %v1485_v23 = vadd.f32 0.112945676, %v1484_v19  ;;  %v1474_v27 = vadd.f32 0.05243302, %v1473_v22 }
 0x76c   : > { %v1438_v42 = vadd.f32 1.1283791, %v1437_v36 }
 0x76d   : > { %2297 = vrcp.f32 %v1449_v21  ;;  %v1486_v25 = vmul.f32 %v1485_v23, %v1468_v0  ;;  %v1475_v33 = vmul.f32 %v1474_v27, %v1468_v0  ;;  %v1461_v38 = vand.u32 2147483648, %v1449_v21 }
 0x76e   : > { %v1459_v40 = vand.u32 2147483647, %v1449_v21  ;;  %vm1455_vm7 = vweird.f32 %v1449_v21  ;;  %v1439_v54 = vmul.f32 %v1438_v42, %v2962_v45 }
 0x76f   : > { %v1487_v28 = vadd.f32 0.4994258, %v1486_v25  ;;  %v1476_v39 = vadd.f32 0.18741608, %v1475_v33  ;;  %v1462_v47 = vor.u32 1.1754944e-38, %v1461_v38 }
 0x770   : > { %vm1460_vm9 = vcmp.eq.f32.partialorder %v1459_v40, 8.507059e+37 }
 0x771   : > { %v1488_v29 = vmul.f32 %v1487_v28, %v1468_v0  ;;  %v1477_v49 = vmul.f32 %v1476_v39, %v1468_v0 }
 0x773   : > { %v2298_v30 = vpop.eup %2297  ;;  %v1489_v34 = vadd.f32 1.0, %v1488_v29  ;;  %v1478_v48 = vadd.f32 1.1283791, %v1477_v49 }
 0x774   : > { %v1451_v32 = vmul.f32 %v2298_v30, %v1449_v21  ;;  %vm1456_vm6 = vweird.f32 %v2298_v30 }
 0x775   : > { %2299 = vrcp.f32 %v1489_v34  ;;  %vm1457_vm8 = vmor %vm1455_vm7, %vm1456_vm6  ;;  %v1501_v57 = vand.u32 2147483648, %v1489_v34  ;;  %v1499_v61 = vand.u32 2147483647, %v1489_v34  ;;  %vm1495_vm12 = vweird.f32 %v1489_v34 }
 0x776   : > { %v1452_v35 = vsub.f32 1.0, %v1451_v32  ;;  %v1479_v0 = vmul.f32 %v1478_v48, %v2975_v58  ;;  %v2258_v58 = vld [vmem:[%s3128_s15] ss:$0 sm:$0xff] }
 0x777   : > { %v1502_v63 = vor.u32 1.1754944e-38, %v1501_v57  ;;  %vm1500_vm14 = vcmp.eq.f32.partialorder %v1499_v61, 8.507059e+37 }
 0x778   : > { %v1453_v37 = vmul.f32 %v2298_v30, %v1452_v35 }
 0x77a   : > { %v1454_v41 = vadd.f32 %v2298_v30, %v1453_v37 }
 0x77b   : > { %v2300_v44 = vpop.eup %2299 }
 0x77c   : > { %v1458_v46 = vsel %vm1457_vm8, %v2298_v30, %v1454_v41  ;;  %v1491_v51 = vmul.f32 %v2300_v44, %v1489_v34  ;;  %vm1496_vm11 = vweird.f32 %v2300_v44 }
 0x77d   : > { %v1463_v52 = vsel %vm1460_vm9, %v1462_v47, %v1458_v46  ;;  %vm1497_vm13 = vmor %vm1495_vm12, %vm1496_vm11 }
 0x77e   : > { %v1492_v56 = vsub.f32 1.0, %v1491_v51  ;;  %v1464_v59 = vmul.f32 %v1463_v52, %v1439_v54 }
 0x780   : > { %v1493_v60 = vmul.f32 %v2300_v44, %v1492_v56  ;;  %v2018_v1 = vclamps-f32 %v1464_v59, 1.0 }
 0x782   : > { %v1494_v62 = vadd.f32 %v2300_v44, %v1493_v60  ;;  %v1507_v4 = vadd.f32 1.0, %v2018_v1 }
 0x784   : > { %v1498_v2 = vsel %vm1497_vm13, %v2300_v44, %v1494_v62  ;;  %v1509_v9 = vmul.f32 %v1507_v4, %v1423_v6 }
 0x785   : > { %v1503_v45 = vsel %vm1500_vm14, %v1502_v63, %v1498_v2 }
 0x786   : > { %v1504_v3 = vmul.f32 %v1503_v45, %v1479_v0 }
 0x788   : > { %v2019_v5 = vclamps-f32 %v1504_v3, 1.0 }
 0x78a   : > { %v1508_v8 = vadd.f32 1.0, %v2019_v5 }
 0x78c   : > { %v1510_v10 = vmul.f32 %v1508_v8, %v1424_v7 }
 0x78e   : > { %v1511_v11 = vpack.c.bf16 %v1510_v10, %v1509_v9 }
 0x790   : > { %1588 = vmatmul.bf16.vlgmr.msrb.gmra.mxu2 %v1511_v11 }
 0x813   : > { %v1589_v12 = vpop.f32.mrf.mxu2 }
 0x814   : > { %v1590_v43 = vadd.f32 %v2258_v58, %v1589_v12 }
 0x816   : > { %v1594_v53 = vadd.f32 %v1590_v43, %v2934_v50 }
 0x818   : > { %1596 = vst.msk [vmem:[%s2735_s28] sm:$0xff] %vm991_vm10, %v1594_v53 }
 0x81b   : > { %v1591_v13 = vpop.f32.mrf.mxu2 }
 0x81c   : > { %v1592_v14 = vadd.f32 %v2258_v58, %v1591_v13 }
 0x81e   : > { %v1595_v15 = vadd.f32 %v1592_v14, %v2938_v55 }
 0x820   : > { %1597 = vst.msk [vmem:[%s2735_s28 + $0x8] sm:$0xff] %vm991_vm10, %v1595_v15 }
 0x821   : > { %2418 = shalt.err (!%p2415_p12)
}
 0x822   : > { %s2528_s28 = smov 128   ;;  %s1604_s24 = scalar_lea.sflag [#allocation14], %s2724_s5 }
 0x823   : > { %2110 = dma.vmem_to_hbm [thread:$0]  (%p2663_p3), %s1619_s14, 256, %s1621_s26, %s1599_s25, %s2528_s28, %s2528_s28, %s2525_s21  }
 0x824   : > { %s2058_s15 = sshll.u32 %s2489_s17, 4  ;;  %s1647_s13 = sshll.u32 %s2737_s18, 4  ;;  %s1648_s13 = int_to_ptr.vmem [resolvable:$true] %s1647_s13 }
 0x825   : > { %s1634_s12 = sadd.s32 %s2058_s15, %s2054_s22  ;;  %s3131_s29 = sld [smem:[#allocation35_spill]] }
 0x826   : > { %s2059_s19 = sshll.u32 %s1634_s12, 3  ;;  %s2529_s5 = smov 256  }
 0x827   : > { %2111 = sst [smem:[#allocation16]] (%p2663_p3), %s2529_s5  ;;  %s2530_s26 = smov 512  }
 0x828   : > { %2112 = sst [smem:[#allocation16 + $0x1]] (%p2663_p3), %s2530_s26  ;;  %s2531_s17 = smov 2  }
 0x829   : > { %2113 = sst [smem:[#allocation16 + $0x2]] (%p2663_p3), %s2531_s17  ;;  %s2532_s16 = smov 128  }
 0x82a   : > { %2114 = sst [smem:[#allocation16 + $0x3]] (%p2663_p3), %s2532_s16  ;;  %s2533_s18 = smov 8  }
 0x82b   : > { %s1636_s21 = scalar_lea.hbm %s3131_s29, %s2059_s19  ;;  %2115 = sst [smem:[#allocation16 + $0x4]] (%p2663_p3), %s2532_s16 }
 0x82c   : > { %s1649_s14 = sshll.u32 %s1636_s21, 4  ;;  %2116 = sst [smem:[#allocation16 + $0x5]] (%p2663_p3), %s2533_s18  ;;  %s1650_s14 = int_to_ptr.hbm [resolvable:$true] %s1649_s14 }
 0x82d   : > { %s2534_s22 = smov [#allocation15]   ;;  %s2535_s25 = smov 0  }
 0x82e   : > { %2117 = dma.general (%p2663_p3), %s1648_s13, 1024, %s1650_s14, %s1604_s24, %s2534_s22, [#allocation16], %s2535_s25, 0  }
 0x82f PF: > { %s3132_s28 = sld [smem:[#allocation25_spill]] }
 0x830   : > { %s3133_s15 = sld [smem:[#allocation21_spill]] }
 0x835   : > { %p2143_p13 = scmp.ge.s32.totalorder %s3132_s28, 2 }
 0x836   : > { %s1677_s19 = sand.u32 1, %s3133_s15  }
 0x837   : > { %p2131_p0 = pnand %p2143_p13, %p2672_p8  ;;  %s1678_s27 = scalar_lea.sflag [#allocation8], %s1677_s19 }
 0x839   : > { %p2132_p1 = pneg %p2131_p0 }
 0x83b   : > { %2464 = dma.done.wait (%p2132_p1), %s1678_s27, 256  }
 0x83c   : > { %2466 = vsyncadd (%p2132_p1), %s1678_s27, 4294967040  ;;  %s1688_s23 = scalar_lea.sflag [#allocation14], %s1677_s19 }
 0x83d   : > { %2468 = dma.done.wait (%p2132_p1), %s1688_s23, 1024  }
 0x83e   : > { %2470 = vsyncadd (%p2132_p1), %s1688_s23, 4294966272  ;;  %s33_s20 = sadd.s32 1, %s3132_s28   ;;  %s3135_s24 = sld [smem:[#allocation22_spill]] }
 0x83f   : > { %p30_p2 = scmp.ge.s32.totalorder %s33_s20, 6   ;;  %s3136_s15 = sld [smem:[#allocation30_spill]] }
 0x840   : > { %s3137_s16 = sld [smem:[#allocation23_spill]]  ;;  %s3141_s29 = smov %s2477_s30 }
 0x841   : > { %s3138_s17 = sld [smem:[#allocation24_spill]]  ;;  %32 = sbr.rel (!%p30_p2) target bundleno = 15 (0xf), region = 179 }
 0x842   : > { %s3139_s18 = sld [smem:[#allocation26_spill]] }
 0x843   : > { %s3140_s19 = sld [smem:[#allocation28_spill]] }
 0x844   : > { %s3142_s30 = smov %s3135_s24 }
 0x846   :  { %1694 = vsyncpa [#allocation7], 1 }
 0x847   :  { %1696 = vsyncpa [#allocation7 + $0x1], 1 }
 0x848   :  { %1697 = vsyncpa [#allocation10], 1 }
 0x849   :  { %1698 = vsyncpa [#allocation8], 1 }
 0x84a   :  { %1700 = vsyncpa [#allocation8 + $0x1], 1 }
 0x84b   :  { %1701 = vsyncpa [#allocation14], 1 }
 0x84c   :  { %1703 = vsyncpa [#allocation14 + $0x1], 1 }

</bundles_post_ra>
